<compile_context>
chip_gen: v5e
topology: v5e:2x2
jax: 0.10.0
libtpu: 0.0.40
codegen_flags: <defaults>
</compile_context>

<pallas_src>
import jax
import jax.numpy as jnp
from jax.experimental import pallas as pl
from jax.experimental.pallas import tpu as pltpu

HIDDEN = 300
OUT = 2
EPS = 1e-5
LANE = 128
HP = 384          # hidden dim padded to a multiple of 128
OP = 128          # output dim padded to one full lane group


def _round_up(n, m):
    return (n + m - 1) // m * m


def _pad2(a, rows, cols):
    r, c = a.shape
    return jnp.pad(a, ((0, rows - r), (0, cols - c)))


def mlp_kernel(x_ref,
               w1_ref, g1_ref, b1_ref,
               w2_ref, g2_ref, b2_ref,
               w3_ref, g3_ref, b3_ref,
               w4_ref, g4_ref, b4_ref,
               w5_ref, bias5_ref,
               o_ref):
    """All matmuls: bf16 operands, f32 accumulation (MXU). BN math in f32 (VPU/EUP)."""

    def bn_relu(h, gamma, beta):
        # BatchNorm1d, training mode: per-batch stats, biased variance, eps=1e-5.
        mean = jnp.mean(h, axis=0, keepdims=True)
        d = h - mean
        var = jnp.mean(d * d, axis=0, keepdims=True)
        # Fold gamma into the rsqrt scale: saves one full-width VPU multiply.
        scale = gamma * jax.lax.rsqrt(var + EPS)
        return jnp.maximum(d * scale + beta, 0.0)

    def dot_bf16(a_bf16, w_ref):
        return jnp.dot(a_bf16, w_ref[...], preferred_element_type=jnp.float32)

    h = dot_bf16(x_ref[...], w1_ref)
    h = bn_relu(h, g1_ref[...], b1_ref[...])

    h = dot_bf16(h.astype(jnp.bfloat16), w2_ref)
    h = bn_relu(h, g2_ref[...], b2_ref[...])

    h = dot_bf16(h.astype(jnp.bfloat16), w3_ref)
    h = bn_relu(h, g3_ref[...], b3_ref[...])

    h = dot_bf16(h.astype(jnp.bfloat16), w4_ref)
    h = bn_relu(h, g4_ref[...], b4_ref[...])

    # Final layer l5: Linear(300, 2) with bias, padded to 128 output lanes.
    out = dot_bf16(h.astype(jnp.bfloat16), w5_ref) + bias5_ref[...]
    o_ref[...] = out.astype(o_ref.dtype)


def mlp_forward(x, params):
    """x: [N, dim] f32; params: logical (unpadded) f32 weights. Returns [N, 2] f32."""
    N, dim = x.shape
    dp = _round_up(dim, LANE)

    # Lane-align and cast MXU operands to bf16. Zero padding keeps the math exact:
    # padded input columns hit zero weight rows, and padded hidden lanes produce
    # exact zeros through BN (gamma padded with 0) + ReLU.
    xp = _pad2(x, N, dp).astype(jnp.bfloat16)
    w1 = _pad2(params["w1"], dp, HP).astype(jnp.bfloat16)
    w2 = _pad2(params["w2"], HP, HP).astype(jnp.bfloat16)
    w3 = _pad2(params["w3"], HP, HP).astype(jnp.bfloat16)
    w4 = _pad2(params["w4"], HP, HP).astype(jnp.bfloat16)
    w5 = _pad2(params["w5"], HP, OP).astype(jnp.bfloat16)
    bias5 = _pad2(params["bias5"], 1, OP).astype(jnp.float32)
    gs = [_pad2(params[f"g{i}"], 1, HP).astype(jnp.float32) for i in range(1, 5)]
    bs = [_pad2(params[f"b{i}"], 1, HP).astype(jnp.float32) for i in range(1, 5)]

    operands = [
        xp,
        w1, gs[0], bs[0],
        w2, gs[1], bs[1],
        w3, gs[2], bs[2],
        w4, gs[3], bs[3],
        w5, bias5,
    ]

    def full_spec(shape):
        return pl.BlockSpec(shape, lambda: (0,) * len(shape))

    out_padded = pl.pallas_call(
        mlp_kernel,
        out_shape=jax.ShapeDtypeStruct((N, OP), jnp.float32),
        grid=(),
        in_specs=[full_spec(op.shape) for op in operands],
        out_specs=full_spec((N, OP)),
        compiler_params=pltpu.CompilerParams(
            vmem_limit_bytes=32 * 1024 * 1024,
        ),
    )(*operands)

    # Drop the lane padding; logical output is [N, 2].
    return out_padded[:, :OUT]


def init_params(key, dim):
    ks = jax.random.split(key, 6)

    # PyTorch Linear weight is [out, in]; store pre-transposed [in, out] for h @ W.
    def lin(k, fan_in, fan_out):
        bound = 1.0 / jnp.sqrt(fan_in)
        return jax.random.uniform(k, (fan_in, fan_out), jnp.float32, -bound, bound)

    params = {
        "w1": lin(ks[0], dim, HIDDEN),
        "w2": lin(ks[1], HIDDEN, HIDDEN),
        "w3": lin(ks[2], HIDDEN, HIDDEN),
        "w4": lin(ks[3], HIDDEN, HIDDEN),
        "w5": lin(ks[4], HIDDEN, OUT),
        "bias5": jax.random.uniform(ks[5], (1, OUT), jnp.float32,
                                    -1.0 / jnp.sqrt(HIDDEN), 1.0 / jnp.sqrt(HIDDEN)),
    }
    # BatchNorm affine params at PyTorch init: gamma=1, beta=0.
    for i in range(1, 5):
        params[f"g{i}"] = jnp.ones((1, HIDDEN), jnp.float32)
        params[f"b{i}"] = jnp.zeros((1, HIDDEN), jnp.float32)
    return params


def reference_forward(x, params):
    """Plain-JAX reference with the same bf16-operand / f32-accumulate matmul
    policy as the kernel, matching PyTorch training-mode BatchNorm semantics."""

    def dot_bf16(a, w):
        return jnp.dot(a.astype(jnp.bfloat16), w.astype(jnp.bfloat16),
                       preferred_element_type=jnp.float32)

    def bn_relu(h, g, b):
        m = jnp.mean(h, axis=0, keepdims=True)
        d = h - m
        v = jnp.mean(d * d, axis=0, keepdims=True)
        return jnp.maximum(d * (g * jax.lax.rsqrt(v + EPS)) + b, 0.0)

    h = dot_bf16(x, params["w1"]); h = bn_relu(h, params["g1"], params["b1"])
    h = dot_bf16(h, params["w2"]); h = bn_relu(h, params["g2"], params["b2"])
    h = dot_bf16(h, params["w3"]); h = bn_relu(h, params["g3"], params["b3"])
    h = dot_bf16(h, params["w4"]); h = bn_relu(h, params["g4"], params["b4"])
    return dot_bf16(h, params["w5"]) + params["bias5"]


if __name__ == "__main__":
    key = jax.random.PRNGKey(0)
    k_x, k_p = jax.random.split(key)

    N, dim = 8, 32  # small batch, small input_dim
    x = jax.random.normal(k_x, (N, dim), jnp.float32)
    params = init_params(k_p, dim)

    out = jax.block_until_ready(mlp_forward(x, params))
    ref = reference_forward(x, params)

    assert out.shape == (N, OUT)
    assert jnp.allclose(out, ref, atol=5e-3, rtol=5e-3), "mismatch vs reference"

    print("KERNEL_OK")
</pallas_src>

<mosaic_0001>
module attributes {stable_mosaic.version = 11 : i64} {
  func.func @mlp_kernel(%arg0: memref<8x128xbf16, #tpu.memory_space<vmem>>, %arg1: memref<128x384xbf16, #tpu.memory_space<vmem>>, %arg2: memref<1x384xf32, #tpu.memory_space<vmem>>, %arg3: memref<1x384xf32, #tpu.memory_space<vmem>>, %arg4: memref<384x384xbf16, #tpu.memory_space<vmem>>, %arg5: memref<1x384xf32, #tpu.memory_space<vmem>>, %arg6: memref<1x384xf32, #tpu.memory_space<vmem>>, %arg7: memref<384x384xbf16, #tpu.memory_space<vmem>>, %arg8: memref<1x384xf32, #tpu.memory_space<vmem>>, %arg9: memref<1x384xf32, #tpu.memory_space<vmem>>, %arg10: memref<384x384xbf16, #tpu.memory_space<vmem>>, %arg11: memref<1x384xf32, #tpu.memory_space<vmem>>, %arg12: memref<1x384xf32, #tpu.memory_space<vmem>>, %arg13: memref<384x128xbf16, #tpu.memory_space<vmem>>, %arg14: memref<1x128xf32, #tpu.memory_space<vmem>>, %arg15: memref<8x128xf32, #tpu.memory_space<vmem>>) attributes {dimension_semantics = [], scalar_prefetch = 0 : i64, scratch_operands = 0 : i64, tpu.core_type = #tpu.core_type<tc>} {
    %c0 = arith.constant 0 : index
    %c0_0 = arith.constant 0 : index
    %0 = vector.load %arg0[%c0, %c0_0] : memref<8x128xbf16, #tpu.memory_space<vmem>>, vector<8x128xbf16>
    %c0_1 = arith.constant 0 : index
    %c0_2 = arith.constant 0 : index
    %1 = vector.load %arg1[%c0_1, %c0_2] : memref<128x384xbf16, #tpu.memory_space<vmem>>, vector<128x384xbf16>
    %cst = arith.constant dense<0.000000e+00> : vector<8x384xf32>
    %2 = tpu.matmul %0, %1, %cst {dimension_numbers = #tpu.dot_dimension_numbers<[1], [0], [0], [1], [0, 0, 1, 1], [], []>} : vector<8x128xbf16>, vector<128x384xbf16>, vector<8x384xf32> -> vector<8x384xf32>
    %c0_3 = arith.constant 0 : index
    %c0_4 = arith.constant 0 : index
    %3 = vector.load %arg2[%c0_3, %c0_4] : memref<1x384xf32, #tpu.memory_space<vmem>>, vector<1x384xf32>
    %c0_5 = arith.constant 0 : index
    %c0_6 = arith.constant 0 : index
    %4 = vector.load %arg3[%c0_5, %c0_6] : memref<1x384xf32, #tpu.memory_space<vmem>>, vector<1x384xf32>
    %cst_7 = arith.constant dense<0.000000e+00> : vector<384xf32>
    %5 = vector.multi_reduction <add>, %2, %cst_7 [0] : vector<8x384xf32> to vector<384xf32>
    %6 = vector.shape_cast %5 : vector<384xf32> to vector<1x384xf32>
    %cst_8 = arith.constant 8.000000e+00 : f32
    %7 = vector.broadcast %cst_8 : f32 to vector<1x384xf32>
    %8 = arith.divf %6, %7 : vector<1x384xf32>
    %9 = vector.broadcast %8 : vector<1x384xf32> to vector<8x384xf32>
    %10 = arith.subf %2, %9 : vector<8x384xf32>
    %11 = arith.mulf %10, %10 : vector<8x384xf32>
    %cst_9 = arith.constant dense<0.000000e+00> : vector<384xf32>
    %12 = vector.multi_reduction <add>, %11, %cst_9 [0] : vector<8x384xf32> to vector<384xf32>
    %13 = vector.shape_cast %12 : vector<384xf32> to vector<1x384xf32>
    %cst_10 = arith.constant 8.000000e+00 : f32
    %14 = vector.broadcast %cst_10 : f32 to vector<1x384xf32>
    %15 = arith.divf %13, %14 : vector<1x384xf32>
    %cst_11 = arith.constant 9.99999974E-6 : f32
    %16 = vector.broadcast %cst_11 : f32 to vector<1x384xf32>
    %17 = arith.addf %15, %16 : vector<1x384xf32>
    %18 = math.rsqrt %17 : vector<1x384xf32>
    %19 = arith.mulf %3, %18 : vector<1x384xf32>
    %20 = vector.broadcast %19 : vector<1x384xf32> to vector<8x384xf32>
    %21 = arith.mulf %10, %20 : vector<8x384xf32>
    %22 = vector.broadcast %4 : vector<1x384xf32> to vector<8x384xf32>
    %23 = arith.addf %21, %22 : vector<8x384xf32>
    %cst_12 = arith.constant 0.000000e+00 : f32
    %24 = vector.broadcast %cst_12 : f32 to vector<8x384xf32>
    %25 = arith.maximumf %23, %24 : vector<8x384xf32>
    %26 = arith.truncf %25 : vector<8x384xf32> to vector<8x384xbf16>
    %c0_13 = arith.constant 0 : index
    %c0_14 = arith.constant 0 : index
    %27 = vector.load %arg4[%c0_13, %c0_14] : memref<384x384xbf16, #tpu.memory_space<vmem>>, vector<384x384xbf16>
    %cst_15 = arith.constant dense<0.000000e+00> : vector<8x384xf32>
    %28 = tpu.matmul %26, %27, %cst_15 {dimension_numbers = #tpu.dot_dimension_numbers<[1], [0], [0], [1], [0, 0, 1, 1], [], []>} : vector<8x384xbf16>, vector<384x384xbf16>, vector<8x384xf32> -> vector<8x384xf32>
    %c0_16 = arith.constant 0 : index
    %c0_17 = arith.constant 0 : index
    %29 = vector.load %arg5[%c0_16, %c0_17] : memref<1x384xf32, #tpu.memory_space<vmem>>, vector<1x384xf32>
    %c0_18 = arith.constant 0 : index
    %c0_19 = arith.constant 0 : index
    %30 = vector.load %arg6[%c0_18, %c0_19] : memref<1x384xf32, #tpu.memory_space<vmem>>, vector<1x384xf32>
    %cst_20 = arith.constant dense<0.000000e+00> : vector<384xf32>
    %31 = vector.multi_reduction <add>, %28, %cst_20 [0] : vector<8x384xf32> to vector<384xf32>
    %32 = vector.shape_cast %31 : vector<384xf32> to vector<1x384xf32>
    %cst_21 = arith.constant 8.000000e+00 : f32
    %33 = vector.broadcast %cst_21 : f32 to vector<1x384xf32>
    %34 = arith.divf %32, %33 : vector<1x384xf32>
    %35 = vector.broadcast %34 : vector<1x384xf32> to vector<8x384xf32>
    %36 = arith.subf %28, %35 : vector<8x384xf32>
    %37 = arith.mulf %36, %36 : vector<8x384xf32>
    %cst_22 = arith.constant dense<0.000000e+00> : vector<384xf32>
    %38 = vector.multi_reduction <add>, %37, %cst_22 [0] : vector<8x384xf32> to vector<384xf32>
    %39 = vector.shape_cast %38 : vector<384xf32> to vector<1x384xf32>
    %cst_23 = arith.constant 8.000000e+00 : f32
    %40 = vector.broadcast %cst_23 : f32 to vector<1x384xf32>
    %41 = arith.divf %39, %40 : vector<1x384xf32>
    %cst_24 = arith.constant 9.99999974E-6 : f32
    %42 = vector.broadcast %cst_24 : f32 to vector<1x384xf32>
    %43 = arith.addf %41, %42 : vector<1x384xf32>
    %44 = math.rsqrt %43 : vector<1x384xf32>
    %45 = arith.mulf %29, %44 : vector<1x384xf32>
    %46 = vector.broadcast %45 : vector<1x384xf32> to vector<8x384xf32>
    %47 = arith.mulf %36, %46 : vector<8x384xf32>
    %48 = vector.broadcast %30 : vector<1x384xf32> to vector<8x384xf32>
    %49 = arith.addf %47, %48 : vector<8x384xf32>
    %cst_25 = arith.constant 0.000000e+00 : f32
    %50 = vector.broadcast %cst_25 : f32 to vector<8x384xf32>
    %51 = arith.maximumf %49, %50 : vector<8x384xf32>
    %52 = arith.truncf %51 : vector<8x384xf32> to vector<8x384xbf16>
    %c0_26 = arith.constant 0 : index
    %c0_27 = arith.constant 0 : index
    %53 = vector.load %arg7[%c0_26, %c0_27] : memref<384x384xbf16, #tpu.memory_space<vmem>>, vector<384x384xbf16>
    %cst_28 = arith.constant dense<0.000000e+00> : vector<8x384xf32>
    %54 = tpu.matmul %52, %53, %cst_28 {dimension_numbers = #tpu.dot_dimension_numbers<[1], [0], [0], [1], [0, 0, 1, 1], [], []>} : vector<8x384xbf16>, vector<384x384xbf16>, vector<8x384xf32> -> vector<8x384xf32>
    %c0_29 = arith.constant 0 : index
    %c0_30 = arith.constant 0 : index
    %55 = vector.load %arg8[%c0_29, %c0_30] : memref<1x384xf32, #tpu.memory_space<vmem>>, vector<1x384xf32>
    %c0_31 = arith.constant 0 : index
    %c0_32 = arith.constant 0 : index
    %56 = vector.load %arg9[%c0_31, %c0_32] : memref<1x384xf32, #tpu.memory_space<vmem>>, vector<1x384xf32>
    %cst_33 = arith.constant dense<0.000000e+00> : vector<384xf32>
    %57 = vector.multi_reduction <add>, %54, %cst_33 [0] : vector<8x384xf32> to vector<384xf32>
    %58 = vector.shape_cast %57 : vector<384xf32> to vector<1x384xf32>
    %cst_34 = arith.constant 8.000000e+00 : f32
    %59 = vector.broadcast %cst_34 : f32 to vector<1x384xf32>
    %60 = arith.divf %58, %59 : vector<1x384xf32>
    %61 = vector.broadcast %60 : vector<1x384xf32> to vector<8x384xf32>
    %62 = arith.subf %54, %61 : vector<8x384xf32>
    %63 = arith.mulf %62, %62 : vector<8x384xf32>
    %cst_35 = arith.constant dense<0.000000e+00> : vector<384xf32>
    %64 = vector.multi_reduction <add>, %63, %cst_35 [0] : vector<8x384xf32> to vector<384xf32>
    %65 = vector.shape_cast %64 : vector<384xf32> to vector<1x384xf32>
    %cst_36 = arith.constant 8.000000e+00 : f32
    %66 = vector.broadcast %cst_36 : f32 to vector<1x384xf32>
    %67 = arith.divf %65, %66 : vector<1x384xf32>
    %cst_37 = arith.constant 9.99999974E-6 : f32
    %68 = vector.broadcast %cst_37 : f32 to vector<1x384xf32>
    %69 = arith.addf %67, %68 : vector<1x384xf32>
    %70 = math.rsqrt %69 : vector<1x384xf32>
    %71 = arith.mulf %55, %70 : vector<1x384xf32>
    %72 = vector.broadcast %71 : vector<1x384xf32> to vector<8x384xf32>
    %73 = arith.mulf %62, %72 : vector<8x384xf32>
    %74 = vector.broadcast %56 : vector<1x384xf32> to vector<8x384xf32>
    %75 = arith.addf %73, %74 : vector<8x384xf32>
    %cst_38 = arith.constant 0.000000e+00 : f32
    %76 = vector.broadcast %cst_38 : f32 to vector<8x384xf32>
    %77 = arith.maximumf %75, %76 : vector<8x384xf32>
    %78 = arith.truncf %77 : vector<8x384xf32> to vector<8x384xbf16>
    %c0_39 = arith.constant 0 : index
    %c0_40 = arith.constant 0 : index
    %79 = vector.load %arg10[%c0_39, %c0_40] : memref<384x384xbf16, #tpu.memory_space<vmem>>, vector<384x384xbf16>
    %cst_41 = arith.constant dense<0.000000e+00> : vector<8x384xf32>
    %80 = tpu.matmul %78, %79, %cst_41 {dimension_numbers = #tpu.dot_dimension_numbers<[1], [0], [0], [1], [0, 0, 1, 1], [], []>} : vector<8x384xbf16>, vector<384x384xbf16>, vector<8x384xf32> -> vector<8x384xf32>
    %c0_42 = arith.constant 0 : index
    %c0_43 = arith.constant 0 : index
    %81 = vector.load %arg11[%c0_42, %c0_43] : memref<1x384xf32, #tpu.memory_space<vmem>>, vector<1x384xf32>
    %c0_44 = arith.constant 0 : index
    %c0_45 = arith.constant 0 : index
    %82 = vector.load %arg12[%c0_44, %c0_45] : memref<1x384xf32, #tpu.memory_space<vmem>>, vector<1x384xf32>
    %cst_46 = arith.constant dense<0.000000e+00> : vector<384xf32>
    %83 = vector.multi_reduction <add>, %80, %cst_46 [0] : vector<8x384xf32> to vector<384xf32>
    %84 = vector.shape_cast %83 : vector<384xf32> to vector<1x384xf32>
    %cst_47 = arith.constant 8.000000e+00 : f32
    %85 = vector.broadcast %cst_47 : f32 to vector<1x384xf32>
    %86 = arith.divf %84, %85 : vector<1x384xf32>
    %87 = vector.broadcast %86 : vector<1x384xf32> to vector<8x384xf32>
    %88 = arith.subf %80, %87 : vector<8x384xf32>
    %89 = arith.mulf %88, %88 : vector<8x384xf32>
    %cst_48 = arith.constant dense<0.000000e+00> : vector<384xf32>
    %90 = vector.multi_reduction <add>, %89, %cst_48 [0] : vector<8x384xf32> to vector<384xf32>
    %91 = vector.shape_cast %90 : vector<384xf32> to vector<1x384xf32>
    %cst_49 = arith.constant 8.000000e+00 : f32
    %92 = vector.broadcast %cst_49 : f32 to vector<1x384xf32>
    %93 = arith.divf %91, %92 : vector<1x384xf32>
    %cst_50 = arith.constant 9.99999974E-6 : f32
    %94 = vector.broadcast %cst_50 : f32 to vector<1x384xf32>
    %95 = arith.addf %93, %94 : vector<1x384xf32>
    %96 = math.rsqrt %95 : vector<1x384xf32>
    %97 = arith.mulf %81, %96 : vector<1x384xf32>
    %98 = vector.broadcast %97 : vector<1x384xf32> to vector<8x384xf32>
    %99 = arith.mulf %88, %98 : vector<8x384xf32>
    %100 = vector.broadcast %82 : vector<1x384xf32> to vector<8x384xf32>
    %101 = arith.addf %99, %100 : vector<8x384xf32>
    %cst_51 = arith.constant 0.000000e+00 : f32
    %102 = vector.broadcast %cst_51 : f32 to vector<8x384xf32>
    %103 = arith.maximumf %101, %102 : vector<8x384xf32>
    %104 = arith.truncf %103 : vector<8x384xf32> to vector<8x384xbf16>
    %c0_52 = arith.constant 0 : index
    %c0_53 = arith.constant 0 : index
    %105 = vector.load %arg13[%c0_52, %c0_53] : memref<384x128xbf16, #tpu.memory_space<vmem>>, vector<384x128xbf16>
    %cst_54 = arith.constant dense<0.000000e+00> : vector<8x128xf32>
    %106 = tpu.matmul %104, %105, %cst_54 {dimension_numbers = #tpu.dot_dimension_numbers<[1], [0], [0], [1], [0, 0, 1, 1], [], []>} : vector<8x384xbf16>, vector<384x128xbf16>, vector<8x128xf32> -> vector<8x128xf32>
    %c0_55 = arith.constant 0 : index
    %c0_56 = arith.constant 0 : index
    %107 = vector.load %arg14[%c0_55, %c0_56] : memref<1x128xf32, #tpu.memory_space<vmem>>, vector<1x128xf32>
    %108 = vector.broadcast %107 : vector<1x128xf32> to vector<8x128xf32>
    %109 = arith.addf %106, %108 : vector<8x128xf32>
    %c0_57 = arith.constant 0 : index
    %c0_58 = arith.constant 0 : index
    %110 = vector.load %arg15[%c0_57, %c0_58] : memref<8x128xf32, #tpu.memory_space<vmem>>, vector<8x128xf32>
    tpu.vector_store %arg15[%c0_57, %c0_58], %109 {strides = array<i32>} : memref<8x128xf32, #tpu.memory_space<vmem>>, vector<8x128xf32>,
    return
  }
}

</mosaic_0001>

<bundles_post_ra>
// kernel: tpu_custom_call.1
= control target key start
LH: loop header
LB: loop body
LE: loop exit
PB: predicated region body
PF: predicated region fallthrough
CT: control target
= control target key end

     0   :  { %20 = vsyncpa [#allocation3], 0  ;;  %s5017_s0 = inlined_call_operand.hbm [shape: bf16[8,128], index: 0, kind: input, shape index: {}]   ;;  %s5018_s1 = inlined_call_operand.hbm [shape: bf16[128,384], index: 1, kind: input, shape index: {}]   ;;  %s5019_s2 = inlined_call_operand.hbm [shape: f32[1,384], index: 2, kind: input, shape index: {}]   ;;  %s5020_s3 = inlined_call_operand.hbm [shape: f32[1,384], index: 3, kind: input, shape index: {}]   ;;  %s5021_s4 = inlined_call_operand.hbm [shape: bf16[384,384], index: 4, kind: input, shape index: {}]   ;;  %s5022_s5 = inlined_call_operand.vmem [shape: f32[1,384], index: 5, kind: input, shape index: {}]   ;;  %s5023_s6 = inlined_call_operand.hbm [shape: f32[1,384], index: 6, kind: input, shape index: {}]   ;;  %s5024_s7 = inlined_call_operand.hbm [shape: bf16[384,384], index: 7, kind: input, shape index: {}]   ;;  %s5025_s8 = inlined_call_operand.vmem [shape: f32[1,384], index: 8, kind: input, shape index: {}]   ;;  %s5026_s9 = inlined_call_operand.hbm [shape: f32[1,384], index: 9, kind: input, shape index: {}]   ;;  %s5027_s10 = inlined_call_operand.hbm [shape: bf16[384,384], index: 10, kind: input, shape index: {}]   ;;  %s5028_s11 = inlined_call_operand.vmem [shape: f32[1,384], index: 11, kind: input, shape index: {}]   ;;  %s5029_s12 = inlined_call_operand.hbm [shape: f32[1,384], index: 12, kind: input, shape index: {}]   ;;  %s5030_s13 = inlined_call_operand.hbm [shape: bf16[384,128], index: 13, kind: input, shape index: {}]   ;;  %s5031_s14 = inlined_call_operand.vmem [shape: f32[1,128], index: 14, kind: input, shape index: {}]   ;;  %s5032_s15 = inlined_call_operand.hbm [shape: f32[8,128], index: 15, kind: output, shape index: {}]  }
   0x1   :  { %21 = vsyncpa [#allocation6], 0 }
   0x2   :  { %22 = vsyncpa [#allocation9], 0 }
   0x3   :  { %23 = vsyncpa [#allocation12], 0 }
   0x4   :  { %24 = vsyncpa [#allocation15], 0 }
   0x5   :  { %25 = vsyncpa [#allocation18], 0  ;;  %s42_s20 = sshll.u32 %s5018_s1, 4  ;;  %s43_s20 = int_to_ptr.hbm [resolvable:$true] %s42_s20 }
   0x6   :  { %26 = vsyncpa [#allocation4], 0  ;;  %s4606_s21 = smov [#allocation5]   ;;  %s67_s25 = sshll.u32 %s5020_s3, 4  ;;  %s68_s25 = int_to_ptr.hbm [resolvable:$true] %s67_s25 }
   0x7   :  { %s44_s22 = sshll.u32 %s4606_s21, 4  ;;  %s4607_s26 = smov 192   ;;  %s45_s22 = int_to_ptr.vmem [resolvable:$true] %s44_s22 }
   0x8   :  { %s4608_s27 = smov 12   ;;  %s4609_s28 = smov [#allocation8]  }
   0x9   :  { %50 = dma.hbm_to_vmem [thread:$0]  %s43_s20, 3072, %s45_s22, [#allocation6], %s4607_s26, %s4607_s26, %s4608_s27  }
   0xa   :  { %s69_s29 = sshll.u32 %s4609_s28, 4  ;;  %s93_s16 = sshll.u32 %s5023_s6, 4  ;;  %s70_s29 = int_to_ptr.vmem [resolvable:$true] %s69_s29  ;;  %s94_s16 = int_to_ptr.hbm [resolvable:$true] %s93_s16 }
   0xb   :  { %72 = dma.hbm_to_vmem [thread:$0]  %s68_s25, 48, %s70_s29, [#allocation9]  }
   0xc   :  { %s119_s3 = sshll.u32 %s5026_s9, 4  ;;  %s4610_s19 = smov [#allocation11]   ;;  %s120_s3 = int_to_ptr.hbm [resolvable:$true] %s119_s3 }
   0xd   :  { %s95_s21 = sshll.u32 %s4610_s19, 4  ;;  %s4611_s20 = smov [#allocation14]   ;;  %s96_s21 = int_to_ptr.vmem [resolvable:$true] %s95_s21 }
   0xe   :  { %98 = dma.hbm_to_vmem [thread:$0]  %s94_s16, 48, %s96_s21, [#allocation12]  }
   0xf   :  { %s121_s22 = sshll.u32 %s4611_s20, 4  ;;  %s145_s28 = sshll.u32 %s5029_s12, 4  ;;  %s122_s22 = int_to_ptr.vmem [resolvable:$true] %s121_s22  ;;  %s146_s28 = int_to_ptr.hbm [resolvable:$true] %s145_s28 }
  0x10   :  { %124 = dma.hbm_to_vmem [thread:$0]  %s120_s3, 48, %s122_s22, [#allocation15]  }
  0x11   :  { %s32_s29 = sshll.u32 %s5017_s0, 4  ;;  %s4612_s30 = smov [#allocation17]   ;;  %s33_s29 = int_to_ptr.hbm [resolvable:$true] %s32_s29 }
  0x12   :  { %s147_s9 = sshll.u32 %s4612_s30, 4  ;;  %s4613_s1 = smov [#allocation2]   ;;  %s148_s9 = int_to_ptr.vmem [resolvable:$true] %s147_s9 }
  0x13   :  { %150 = dma.hbm_to_vmem [thread:$0]  %s146_s28, 48, %s148_s9, [#allocation18]  }
  0x14   :  { %s34_s16 = sshll.u32 %s4613_s1, 4  ;;  %s56_s19 = sshll.u32 %s5019_s2, 4  ;;  %s35_s16 = int_to_ptr.vmem [resolvable:$true] %s34_s16  ;;  %s57_s19 = int_to_ptr.hbm [resolvable:$true] %s56_s19 }
  0x15   :  { %37 = dma.hbm_to_vmem [thread:$0]  %s33_s29, 64, %s35_s16, [#allocation3]  }
  0x16   :  { %s77_s21 = sshll.u32 %s5021_s4, 4  ;;  %s4614_s20 = smov [#allocation7]   ;;  %s78_s21 = int_to_ptr.hbm [resolvable:$true] %s77_s21 }
  0x17   :  { %s58_s0 = sshll.u32 %s4614_s20, 4  ;;  %s4615_s22 = smov [#allocation10]   ;;  %s59_s0 = int_to_ptr.vmem [resolvable:$true] %s58_s0 }
  0x18   :  { %61 = dma.hbm_to_vmem [thread:$0]  %s57_s19, 48, %s59_s0, [#allocation6]  }
  0x19   :  { %s79_s23 = sshll.u32 %s4615_s22, 4  ;;  %s103_s6 = sshll.u32 %s5024_s7, 4  ;;  %s80_s23 = int_to_ptr.vmem [resolvable:$true] %s79_s23  ;;  %s104_s6 = int_to_ptr.hbm [resolvable:$true] %s103_s6 }
  0x1a   :  { %85 = dma.hbm_to_vmem [thread:$0]  %s78_s21, 9216, %s80_s23, [#allocation9], %s4607_s26, %s4607_s26, %s4608_s27  }
  0x1b   :  { %s129_s4 = sshll.u32 %s5027_s10, 4  ;;  %s4616_s29 = smov [#allocation13]   ;;  %s130_s4 = int_to_ptr.hbm [resolvable:$true] %s129_s4 }
  0x1c   :  { %s105_s30 = sshll.u32 %s4616_s29, 4  ;;  %s4617_s9 = smov [#allocation16]   ;;  %s106_s30 = int_to_ptr.vmem [resolvable:$true] %s105_s30 }
  0x1d   :  { %111 = dma.hbm_to_vmem [thread:$0]  %s104_s6, 9216, %s106_s30, [#allocation12], %s4607_s26, %s4607_s26, %s4608_s27  }
  0x1e   :  { %s131_s7 = sshll.u32 %s4617_s9, 4  ;;  %s155_s17 = sshll.u32 %s5030_s13, 4  ;;  %s132_s7 = int_to_ptr.vmem [resolvable:$true] %s131_s7  ;;  %s156_s17 = int_to_ptr.hbm [resolvable:$true] %s155_s17 }
  0x1f   :  { %137 = dma.hbm_to_vmem [thread:$0]  %s130_s4, 9216, %s132_s7, [#allocation15], %s4607_s26, %s4607_s26, %s4608_s27  }
  0x20   :  { %s4618_s10 = smov [#allocation19]   ;;  %s4619_s19 = smov 64  }
  0x21   :  { %s157_s18 = sshll.u32 %s4618_s10, 4  ;;  %s4620_s12 = smov 4   ;;  %s158_s18 = int_to_ptr.vmem [resolvable:$true] %s157_s18 }
  0x22   :  { %163 = dma.hbm_to_vmem [thread:$0]  %s156_s17, 3072, %s158_s18, [#allocation18], %s4619_s19, %s4619_s19, %s4620_s12  }
  0x23   :  { %4592 = dma.done.wait [#allocation3], 64  }
  0x24   :  { %4593 = vsyncadd [#allocation3], 4294967232 }
  0x25   :  { %4594 = dma.done.wait [#allocation6], 3120  }
  0x26   :  { %4595 = vsyncadd [#allocation6], 4294964176 }
  0x27   :  { %4596 = dma.done.wait [#allocation9], 9264  }
  0x28   :  { %4597 = vsyncadd [#allocation9], 4294958032 }
  0x29   :  { %4598 = dma.done.wait [#allocation12], 9264  }
  0x2a   :  { %4599 = vsyncadd [#allocation12], 4294958032 }
  0x2b   :  { %4600 = dma.done.wait [#allocation15], 9264  }
  0x2c   :  { %4601 = vsyncadd [#allocation15], 4294958032 }
  0x2d   :  { %4602 = dma.done.wait [#allocation18], 3120  }
  0x2e   :  { %4603 = vsyncadd [#allocation18], 4294964176  ;;  %v3026_v0 = vld [vmem:[#allocation5 + $0xa8] sm:$0xf]  ;;  %v4018_v1 = vld [vmem:[#allocation5 + $0xb0] sm:$0xf0] }
  0x2f   :  { %v4017_v2 = vld [vmem:[#allocation5 + $0xac] sm:$0xf]  ;;  %v3027_v3 = vor.u32 %v4018_v1, %v3026_v0  ;;  %v3028_v4 = vld [vmem:[#allocation5 + $0xb4] sm:$0xf0]  ;;  %v3034_v5 = vld [vmem:[#allocation5 + $0xb0] sm:$0xf] }
  0x30   :  { %v4019_v6 = vld [vmem:[#allocation5 + $0xb8] sm:$0xf0]  ;;  %v3031_v7 = vor.u32 %v4017_v2, %v3028_v4  ;;  %v3014_v9 = vld [vmem:[#allocation5 + $0x90] sm:$0xf]  ;;  %v4014_v11 = vld [vmem:[#allocation5 + $0x94] sm:$0xf] }
  0x31   :  { %v3035_v8 = vor.u32 %v4019_v6, %v3034_v5  ;;  %v4015_v10 = vld [vmem:[#allocation5 + $0x98] sm:$0xf0]  ;;  %371 = vmatpush.bf16.msra.mxu0 %v3027_v3  ;;  %v3016_v13 = vld [vmem:[#allocation5 + $0x9c] sm:$0xf0]  ;;  %v3022_v14 = vld [vmem:[#allocation5 + $0x98] sm:$0xf] }
  0x32   :  { %v3015_v12 = vor.u32 %v4015_v10, %v3014_v9  ;;  %v4016_v15 = vld [vmem:[#allocation5 + $0xa0] sm:$0xf0]  ;;  %384 = vmatpush.bf16.msra.mxu1 %v3031_v7  ;;  %v3019_v16 = vor.u32 %v4014_v11, %v3016_v13  ;;  %v3002_v18 = vld [vmem:[#allocation5 + $0x78] sm:$0xf]  ;;  %v4011_v20 = vld [vmem:[#allocation5 + $0x7c] sm:$0xf] }
  0x33   :  { %397 = vmatpush.bf16.msra.mxu2 %v3035_v8  ;;  %v3023_v17 = vor.u32 %v4016_v15, %v3022_v14  ;;  %v4012_v19 = vld [vmem:[#allocation5 + $0x80] sm:$0xf0]  ;;  %v3004_v21 = vld [vmem:[#allocation5 + $0x84] sm:$0xf0]  ;;  %v3010_v22 = vld [vmem:[#allocation5 + $0x80] sm:$0xf] }
  0x34   :  { %v4013_v23 = vld [vmem:[#allocation5 + $0x88] sm:$0xf0]  ;;  %v3003_v24 = vor.u32 %v4012_v19, %v3002_v18  ;;  %v3007_v25 = vor.u32 %v4011_v20, %v3004_v21  ;;  %v2990_v27 = vld [vmem:[#allocation5 + $0x60] sm:$0xf]  ;;  %v4008_v29 = vld [vmem:[#allocation5 + $0x64] sm:$0xf] }
  0x35   :  { %372 = vmatpush.bf16.msra.mxu0 %v3015_v12  ;;  %v3011_v26 = vor.u32 %v4013_v23, %v3010_v22  ;;  %v4009_v28 = vld [vmem:[#allocation5 + $0x68] sm:$0xf0]  ;;  %v2992_v30 = vld [vmem:[#allocation5 + $0x6c] sm:$0xf0]  ;;  %v2998_v31 = vld [vmem:[#allocation5 + $0x68] sm:$0xf] }
  0x36   :  { %385 = vmatpush.bf16.msra.mxu1 %v3019_v16  ;;  %v4010_v32 = vld [vmem:[#allocation5 + $0x70] sm:$0xf0]  ;;  %v2991_v33 = vor.u32 %v4009_v28, %v2990_v27  ;;  %v2995_v34 = vor.u32 %v4008_v29, %v2992_v30  ;;  %v2978_v36 = vld [vmem:[#allocation5 + $0x48] sm:$0xf]  ;;  %v4005_v38 = vld [vmem:[#allocation5 + $0x4c] sm:$0xf] }
  0x37   :  { %398 = vmatpush.bf16.msra.mxu2 %v3023_v17  ;;  %v2999_v35 = vor.u32 %v4010_v32, %v2998_v31  ;;  %v4006_v37 = vld [vmem:[#allocation5 + $0x50] sm:$0xf0]  ;;  %v2980_v39 = vld [vmem:[#allocation5 + $0x54] sm:$0xf0]  ;;  %v2986_v40 = vld [vmem:[#allocation5 + $0x50] sm:$0xf] }
  0x38   :  { %v4007_v41 = vld [vmem:[#allocation5 + $0x58] sm:$0xf0]  ;;  %v2979_v42 = vor.u32 %v4006_v37, %v2978_v36  ;;  %v2966_v43 = vld [vmem:[#allocation5 + $0x30] sm:$0xf]  ;;  %v2983_v44 = vor.u32 %v4005_v38, %v2980_v39  ;;  %v4002_v47 = vld [vmem:[#allocation5 + $0x34] sm:$0xf] }
  0x39   :  { %373 = vmatpush.bf16.msra.mxu0 %v3003_v24  ;;  %v2987_v45 = vor.u32 %v4007_v41, %v2986_v40  ;;  %v4003_v46 = vld [vmem:[#allocation5 + $0x38] sm:$0xf0]  ;;  %v2968_v48 = vld [vmem:[#allocation5 + $0x3c] sm:$0xf0]  ;;  %v2974_v49 = vld [vmem:[#allocation5 + $0x38] sm:$0xf] }
  0x3a   :  { %386 = vmatpush.bf16.msra.mxu1 %v3007_v25  ;;  %v4004_v50 = vld [vmem:[#allocation5 + $0x40] sm:$0xf0]  ;;  %v2967_v51 = vor.u32 %v4003_v46, %v2966_v43  ;;  %v2971_v52 = vor.u32 %v4002_v47, %v2968_v48  ;;  %v2954_v54 = vld [vmem:[#allocation5 + $0x18] sm:$0xf]  ;;  %v3999_v56 = vld [vmem:[#allocation5 + $0x1c] sm:$0xf] }
  0x3b   :  { %399 = vmatpush.bf16.msra.mxu2 %v3011_v26  ;;  %v2975_v53 = vor.u32 %v4004_v50, %v2974_v49  ;;  %v4000_v55 = vld [vmem:[#allocation5 + $0x20] sm:$0xf0]  ;;  %v2956_v57 = vld [vmem:[#allocation5 + $0x24] sm:$0xf0]  ;;  %v2962_v58 = vld [vmem:[#allocation5 + $0x20] sm:$0xf] }
  0x3c   :  { %v4001_v59 = vld [vmem:[#allocation5 + $0x28] sm:$0xf0]  ;;  %v2955_v60 = vor.u32 %v4000_v55, %v2954_v54  ;;  %v2959_v61 = vor.u32 %v3999_v56, %v2956_v57  ;;  %v2942_v63 = vld [vmem:[#allocation5] sm:$0xf]  ;;  %v3996_v1 = vld [vmem:[#allocation5 + $0x4] sm:$0xf] }
  0x3d   :  { %374 = vmatpush.bf16.msra.mxu0 %v2991_v33  ;;  %v2963_v62 = vor.u32 %v4001_v59, %v2962_v58  ;;  %v3997_v0 = vld [vmem:[#allocation5 + $0x8] sm:$0xf0]  ;;  %v2944_v2 = vld [vmem:[#allocation5 + $0xc] sm:$0xf0]  ;;  %v2950_v3 = vld [vmem:[#allocation5 + $0x8] sm:$0xf] }
  0x3e   :  { %387 = vmatpush.bf16.msra.mxu1 %v2995_v34  ;;  %v3998_v4 = vld [vmem:[#allocation5 + $0x10] sm:$0xf0]  ;;  %v2943_v5 = vor.u32 %v3997_v0, %v2942_v63  ;;  %v2947_v6 = vor.u32 %v3996_v1, %v2944_v2  ;;  %v210_v8 = vld [vmem:[#allocation2] sm:$0xf]  ;;  %v3122_v9 = vld [vmem:[#allocation10 + $0xa8] sm:$0xf] }
  0x3f   :  { %400 = vmatpush.bf16.msra.mxu2 %v2999_v35  ;;  %v2951_v7 = vor.u32 %v3998_v4, %v2950_v3  ;;  %v4042_v10 = vld [vmem:[#allocation10 + $0xb0] sm:$0xf0]  ;;  %v4621_v12 = vmov 8.0   ;;  %v3110_v13 = vld [vmem:[#allocation10 + $0x90] sm:$0xf]  ;;  %vm505_vm9 = vcmask 1040384  }
  0x40   :  { %v3123_v11 = vor.u32 %v4042_v10, %v3122_v9  ;;  %4278 = vrcp.f32 %v4621_v12  ;;  %v4039_v14 = vld [vmem:[#allocation10 + $0x98] sm:$0xf0]  ;;  %v3098_v17 = vld [vmem:[#allocation10 + $0x78] sm:$0xf]  ;;  %v4036_v18 = vld [vmem:[#allocation10 + $0x80] sm:$0xf0] }
  0x41   :  { %375 = vmatpush.bf16.msra.mxu0 %v2979_v42  ;;  %v3111_v15 = vor.u32 %v4039_v14, %v3110_v13  ;;  %v3099_v19 = vor.u32 %v4036_v18, %v3098_v17  ;;  %v3086_v21 = vld [vmem:[#allocation10 + $0x60] sm:$0xf]  ;;  %v4033_v22 = vld [vmem:[#allocation10 + $0x68] sm:$0xf0]  ;;  %v3218_v24 = vld [vmem:[#allocation10 + $0x168] sm:$0xf] }
  0x42   :  { %388 = vmatpush.bf16.msra.mxu1 %v2983_v44  ;;  %1017 = vmatpush.bf16.msra.mxu3 %v3123_v11  ;;  %v3087_v23 = vor.u32 %v4033_v22, %v3086_v21  ;;  %v4066_v25 = vld [vmem:[#allocation10 + $0x170] sm:$0xf0]  ;;  %v3314_v26 = vld [vmem:[#allocation10 + $0x228] sm:$0xf]  ;;  %v4041_v29 = vld [vmem:[#allocation10 + $0xac] sm:$0xf] }
  0x43   :  { %401 = vmatpush.bf16.msra.mxu2 %v2987_v45  ;;  %v3219_v27 = vor.u32 %v4066_v25, %v3218_v24  ;;  %v4090_v28 = vld [vmem:[#allocation10 + $0x230] sm:$0xf0]  ;;  %v3124_v30 = vld [vmem:[#allocation10 + $0xb4] sm:$0xf0]  ;;  %v3074_v34 = vld [vmem:[#allocation10 + $0x48] sm:$0xf] }
  0x44   :  { %v3315_v32 = vor.u32 %v4090_v28, %v3314_v26  ;;  %v3127_v33 = vor.u32 %v4041_v29, %v3124_v30  ;;  %v4030_v35 = vld [vmem:[#allocation10 + $0x50] sm:$0xf0]  ;;  %v3206_v38 = vld [vmem:[#allocation10 + $0x150] sm:$0xf]  ;;  %v4063_v39 = vld [vmem:[#allocation10 + $0x158] sm:$0xf0] }
  0x45   :  { %376 = vmatpush.bf16.msra.mxu0 %v2967_v51  ;;  %v3075_v37 = vor.u32 %v4030_v35, %v3074_v34  ;;  %v3302_v40 = vld [vmem:[#allocation10 + $0x210] sm:$0xf]  ;;  %v3207_v43 = vor.u32 %v4063_v39, %v3206_v38  ;;  %v4087_v44 = vld [vmem:[#allocation10 + $0x218] sm:$0xf0]  ;;  %v4038_v45 = vld [vmem:[#allocation10 + $0x94] sm:$0xf] }
  0x46   :  { %389 = vmatpush.bf16.msra.mxu1 %v2971_v52  ;;  %1018 = vmatpush.bf16.msra.mxu3 %v3111_v15  ;;  %v4748_v16 = vpop.eup %4278  ;;  %v3303_v48 = vor.u32 %v4087_v44, %v3302_v40  ;;  %v3112_v49 = vld [vmem:[#allocation10 + $0x9c] sm:$0xf0]  ;;  %v3062_v52 = vld [vmem:[#allocation10 + $0x30] sm:$0xf]  ;;  %v3194_v56 = vld [vmem:[#allocation10 + $0x138] sm:$0xf] }
  0x47   :  { %402 = vmatpush.bf16.msra.mxu2 %v2975_v53  ;;  %v431_v20 = vmul.f32 8.0, %v4748_v16  ;;  %v3115_v51 = vor.u32 %v4038_v45, %v3112_v49  ;;  %v4027_v53 = vld [vmem:[#allocation10 + $0x38] sm:$0xf0]  ;;  %v4060_v57 = vld [vmem:[#allocation10 + $0x140] sm:$0xf0]  ;;  %vm435_vm0 = vweird.f32 %v4748_v16  ;;  %vm507_vm11 = vcmask 1041408  }
  0x48   :  { %v3063_v55 = vor.u32 %v4027_v53, %v3062_v52  ;;  %v3290_v58 = vld [vmem:[#allocation10 + $0x1f8] sm:$0xf]  ;;  %v3100_v2 = vld [vmem:[#allocation10 + $0x84] sm:$0xf0]  ;;  %v3182_v12 = vld [vmem:[#allocation10 + $0x120] sm:$0xf] }
  0x49   :  { %377 = vmatpush.bf16.msra.mxu0 %v2955_v60  ;;  %v432_v31 = vsub.f32 1.0, %v431_v20  ;;  %v3195_v60 = vor.u32 %v4060_v57, %v3194_v56  ;;  %v4057_v13 = vld [vmem:[#allocation10 + $0x128] sm:$0xf0]  ;;  %v3278_v18 = vld [vmem:[#allocation10 + $0x1e0] sm:$0xf]  ;;  %s4622_s20 = smov [#allocation20]  }
  0x4a   :  { %390 = vmatpush.bf16.msra.mxu1 %v2959_v61  ;;  %1019 = vmatpush.bf16.msra.mxu3 %v3099_v19  ;;  %v4084_v61 = vld [vmem:[#allocation10 + $0x200] sm:$0xf0]  ;;  %v3183_v17 = vor.u32 %v4057_v13, %v3182_v12  ;;  %v4081_v19 = vld [vmem:[#allocation10 + $0x1e8] sm:$0xf0]  ;;  %v3088_v25 = vld [vmem:[#allocation10 + $0x6c] sm:$0xf0] }
  0x4b   :  { %403 = vmatpush.bf16.msra.mxu2 %v2963_v62  ;;  %v433_v46 = vmul.f32 %v4748_v16, %v432_v31  ;;  %v4035_v62 = vld [vmem:[#allocation10 + $0x7c] sm:$0xf]  ;;  %v3291_v1 = vor.u32 %v4084_v61, %v3290_v58  ;;  %v4032_v24 = vld [vmem:[#allocation10 + $0x64] sm:$0xf]  ;;  %v3038_v28 = vld [vmem:[#allocation10] sm:$0xf] }
  0x4c   :  { %v4021_v29 = vld [vmem:[#allocation10 + $0x8] sm:$0xf0]  ;;  %v4054_v34 = vld [vmem:[#allocation10 + $0x110] sm:$0xf0]  ;;  %v3076_v44 = vld [vmem:[#allocation10 + $0x54] sm:$0xf0] }
  0x4d   :  { %378 = vmatpush.bf16.msra.mxu0 %v2943_v5  ;;  %v434_v63 = vadd.f32 %v4748_v16, %v433_v46  ;;  %v3103_v5 = vor.u32 %v4035_v62, %v3100_v2  ;;  %v4078_v38 = vld [vmem:[#allocation10 + $0x1d0] sm:$0xf0]  ;;  %v4029_v39 = vld [vmem:[#allocation10 + $0x4c] sm:$0xf]  ;;  %v3220_v46 = vld [vmem:[#allocation10 + $0x174] sm:$0xf0] }
  0x4e   :  { %391 = vmatpush.bf16.msra.mxu1 %v2947_v6  ;;  %1020 = vmatpush.bf16.msra.mxu3 %v3087_v23  ;;  %v3050_v6 = vld [vmem:[#allocation10 + $0x18] sm:$0xf]  ;;  %v3279_v23 = vor.u32 %v4081_v19, %v3278_v18  ;;  %v4065_v45 = vld [vmem:[#allocation10 + $0x16c] sm:$0xf]  ;;  %v3079_v49 = vor.u32 %v4029_v39, %v3076_v44  ;;  %v3158_v53 = vld [vmem:[#allocation10 + $0xf0] sm:$0xf] }
  0x4f   :  { %404 = vmatpush.bf16.msra.mxu2 %v2951_v7  ;;  %v4024_v7 = vld [vmem:[#allocation10 + $0x20] sm:$0xf0]  ;;  %v4768_v20 = vsel %vm435_vm0, %v4748_v16, %v434_v63  ;;  %v3254_v57 = vld [vmem:[#allocation10 + $0x1b0] sm:$0xf]  ;;  %v4026_v58 = vld [vmem:[#allocation10 + $0x34] sm:$0xf] }
  0x50   :  { %379 = vmatmul.bf16.vlgmr.msra.gmra.mxu0 %v210_v8  ;;  %v3051_v11 = vor.u32 %v4024_v7, %v3050_v6  ;;  %v4062_v62 = vld [vmem:[#allocation10 + $0x154] sm:$0xf]  ;;  %v3208_v63 = vld [vmem:[#allocation10 + $0x15c] sm:$0xf0]  ;;  %v3146_v6 = vld [vmem:[#allocation10 + $0xd8] sm:$0xf] }
  0x51   :  { %392 = vmatmul.bf16.vlgmr.msra.gmra.mxu1 %v210_v8  ;;  %1030 = vmatpush.bf16.msrb.mxu0 %v3219_v27  ;;  %v3091_v27 = vor.u32 %v4032_v24, %v3088_v25  ;;  %v3211_v2 = vor.u32 %v4062_v62, %v3208_v63  ;;  %v4048_v7 = vld [vmem:[#allocation10 + $0xe0] sm:$0xf0]  ;;  %v4023_v12 = vld [vmem:[#allocation10 + $0x1c] sm:$0xf]  ;;  %v3196_v19 = vld [vmem:[#allocation10 + $0x144] sm:$0xf0] }
  0x52   :  { %405 = vmatmul.bf16.vlgmr.msra.gmra.mxu2 %v210_v8  ;;  %1043 = vmatpush.bf16.msrb.mxu1 %v3315_v32  ;;  %v3039_v32 = vor.u32 %v4021_v29, %v3038_v28  ;;  %v4059_v18 = vld [vmem:[#allocation10 + $0x13c] sm:$0xf]  ;;  %v3230_v29 = vld [vmem:[#allocation10 + $0x180] sm:$0xf]  ;;  %v3184_v39 = vld [vmem:[#allocation10 + $0x12c] sm:$0xf0] }
  0x53   :  { %1056 = vmatpush.bf16.msrb.mxu2 %v3127_v33  ;;  %1021 = vmatpush.bf16.msra.mxu3 %v3075_v37  ;;  %v3170_v33 = vld [vmem:[#allocation10 + $0x108] sm:$0xf]  ;;  %v3118_v62 = vld [vmem:[#allocation10 + $0x98] sm:$0xf]  ;;  %s2923_s0 = sshll.u32 %s4622_s20, 4  ;;  %s2925_s24 = sshll.u32 %s5032_s15, 4  ;;  %s2924_s0 = int_to_ptr.vmem [resolvable:$true] %s2923_s0  ;;  %s2926_s24 = int_to_ptr.hbm [resolvable:$true] %s2925_s24 }
  0x54   :  { %v3171_v35 = vor.u32 %v4054_v34, %v3170_v33  ;;  %v3266_v37 = vld [vmem:[#allocation10 + $0x1c8] sm:$0xf] }
  0x55   :  { %1031 = vmatpush.bf16.msrb.mxu0 %v3207_v43  ;;  %v3267_v43 = vor.u32 %v4078_v38, %v3266_v37 }
  0x56   :  { %1044 = vmatpush.bf16.msrb.mxu1 %v3303_v48 }
  0x57   :  { %1057 = vmatpush.bf16.msrb.mxu2 %v3115_v51  ;;  %1022 = vmatpush.bf16.msra.mxu3 %v3063_v55 }
  0x59   :  { %1032 = vmatpush.bf16.msrb.mxu0 %v3195_v60 }
  0x5a   :  { %1045 = vmatpush.bf16.msrb.mxu1 %v3291_v1 }
  0x5b   :  { %1058 = vmatpush.bf16.msrb.mxu2 %v3103_v5  ;;  %1023 = vmatpush.bf16.msra.mxu3 %v3051_v11  ;;  %v4072_v11 = vld [vmem:[#allocation10 + $0x1a0] sm:$0xf0] }
  0x5d   :  { %1033 = vmatpush.bf16.msrb.mxu0 %v3183_v17  ;;  %v3052_v17 = vld [vmem:[#allocation10 + $0x24] sm:$0xf0] }
  0x5e   :  { %1046 = vmatpush.bf16.msrb.mxu1 %v3279_v23  ;;  %v3199_v23 = vor.u32 %v4059_v18, %v3196_v19  ;;  %v3106_v18 = vld [vmem:[#allocation10 + $0x80] sm:$0xf]  ;;  %v4037_v19 = vld [vmem:[#allocation10 + $0x88] sm:$0xf0] }
  0x5f   :  { %1059 = vmatpush.bf16.msrb.mxu2 %v3091_v27  ;;  %1024 = vmatpush.bf16.msra.mxu3 %v3039_v32  ;;  %v4045_v27 = vld [vmem:[#allocation10 + $0xc8] sm:$0xf0] }
  0x61   :  { %1034 = vmatpush.bf16.msrb.mxu0 %v3171_v35  ;;  %v4056_v35 = vld [vmem:[#allocation10 + $0x124] sm:$0xf] }
  0x62   :  { %1047 = vmatpush.bf16.msrb.mxu1 %v3267_v43  ;;  %v3187_v44 = vor.u32 %v4056_v35, %v3184_v39  ;;  %v4058_v35 = vld [vmem:[#allocation10 + $0x130] sm:$0xf0] }
  0x63   :  { %1060 = vmatpush.bf16.msrb.mxu2 %v3079_v49 }
  0xcd   :  { %v4751_v36 = vpop.f32.mrf.mxu0 }
  0xce   :  { %v412_v41 = vrot.slane %v4751_v36, 4  ;;  %v4754_v42 = vpop.f32.mrf.mxu1 }
  0xcf   :  { %v418_v47 = vrot.slane %v4754_v42, 4 }
  0xd0   :  { %v413_v50 = vadd.f32 %v412_v41, %v4751_v36 }
  0xd1   :  { %v419_v54 = vadd.f32 %v418_v47, %v4754_v42 }
  0xd2   :  { %v414_v59 = vrot.slane %v413_v50, 2 }
  0xd3   :  { %v420_v0 = vrot.slane %v419_v54, 2 }
  0xd4   :  { %v415_v3 = vadd.f32 %v414_v59, %v413_v50  ;;  %v3223_v50 = vor.u32 %v4065_v45, %v3220_v46  ;;  %v3316_v45 = vld [vmem:[#allocation10 + $0x234] sm:$0xf0]  ;;  %v3130_v46 = vld [vmem:[#allocation10 + $0xb0] sm:$0xf] }
  0xd5   :  { %v4762_v4 = vpop.f32.mrf.mxu2  ;;  %v421_v8 = vadd.f32 %v420_v0, %v419_v54  ;;  %v382_v10 = vpop.f32.mrf.mxu0  ;;  %v4051_v54 = vld [vmem:[#allocation10 + $0xf8] sm:$0xf0] }
  0xd6   :  { %v424_v9 = vrot.slane %v4762_v4, 4  ;;  %v416_v14 = vrot.slane %v415_v3, 1  ;;  %v395_v15 = vpop.f32.mrf.mxu1  ;;  %1069 = vmatpush.bf16.msrb.mxu3 %v3223_v50  ;;  %v3159_v56 = vor.u32 %v4051_v54, %v3158_v53  ;;  %v3242_v10 = vld [vmem:[#allocation10 + $0x198] sm:$0xf]  ;;  %v4043_v50 = vld [vmem:[#allocation10 + $0xb8] sm:$0xf0] }
  0xd7   :  { %v422_v21 = vrot.slane %v421_v8, 1  ;;  %v3243_v15 = vor.u32 %v4072_v11, %v3242_v10  ;;  %v4067_v53 = vld [vmem:[#allocation10 + $0x178] sm:$0xf0]  ;;  %v3160_v10 = vld [vmem:[#allocation10 + $0xfc] sm:$0xf0] }
  0xd8   :  { %v425_v22 = vadd.f32 %v424_v9, %v4762_v4  ;;  %v417_v26 = vadd.f32 %v416_v14, %v415_v3  ;;  %1035 = vmatpush.bf16.msrb.mxu0 %v3159_v56  ;;  %v3147_v9 = vor.u32 %v4048_v7, %v3146_v6  ;;  %v3131_v56 = vor.u32 %v4043_v50, %v3130_v46  ;;  %v4077_v46 = vld [vmem:[#allocation10 + $0x1cc] sm:$0xf] }
  0xd9   :  { %v423_v30 = vadd.f32 %v422_v21, %v421_v8 }
  0xda   :  { %v426_v31 = vrot.slane %v425_v22, 2  ;;  %v437_v16 = vmul.f32 %v4768_v20, %v417_v26  ;;  %1070 = vmatpush.bf16.msrb.mxu3 %v3211_v2  ;;  %v3134_v26 = vld [vmem:[#allocation10 + $0xc0] sm:$0xf]  ;;  %v4040_v2 = vld [vmem:[#allocation10 + $0xa0] sm:$0xf0] }
  0xdb   :  { %v438_v40 = vmul.f32 %v4768_v20, %v423_v30  ;;  %v4069_v30 = vld [vmem:[#allocation10 + $0x188] sm:$0xf0]  ;;  %v3119_v7 = vor.u32 %v4040_v2, %v3118_v62  ;;  %v4028_v62 = vld [vmem:[#allocation10 + $0x40] sm:$0xf0] }
  0xdc   :  { %v427_v41 = vadd.f32 %v426_v31, %v425_v22  ;;  %v4774_v47 = vsub.f32 %v4751_v36, %v437_v16  ;;  %v4075_v36 = vld [vmem:[#allocation10 + $0x1b8] sm:$0xf0]  ;;  %1036 = vmatpush.bf16.msrb.mxu0 %v3147_v9  ;;  %v3055_v22 = vor.u32 %v4023_v12, %v3052_v17  ;;  %v4020_v31 = vld [vmem:[#allocation10 + $0x4] sm:$0xf]  ;;  %v3231_v34 = vor.u32 %v4069_v30, %v3230_v29  ;;  %v3040_v16 = vld [vmem:[#allocation10 + $0xc] sm:$0xf0] }
  0xdd   :  { %v408_v48 = vpop.f32.mrf.mxu2  ;;  %v4777_v51 = vsub.f32 %v4754_v42, %v438_v40  ;;  %v3255_v61 = vor.u32 %v4075_v36, %v3254_v57  ;;  %v3064_v42 = vld [vmem:[#allocation10 + $0x3c] sm:$0xf0]  ;;  %v3043_v38 = vor.u32 %v4020_v31, %v3040_v16  ;;  %v4089_v40 = vld [vmem:[#allocation10 + $0x22c] sm:$0xf]  ;;  %v4050_v9 = vld [vmem:[#allocation10 + $0xf4] sm:$0xf] }
  0xde   :  { %v428_v52 = vrot.slane %v427_v41, 1  ;;  %v443_v55 = vmul.f32 %v4774_v47, %v4774_v47  ;;  %v3067_v1 = vor.u32 %v4026_v58, %v3064_v42  ;;  %1071 = vmatpush.bf16.msrb.mxu3 %v3199_v23  ;;  %v3319_v49 = vor.u32 %v4089_v40, %v3316_v45  ;;  %v4053_v36 = vld [vmem:[#allocation10 + $0x10c] sm:$0xf]  ;;  %v3172_v58 = vld [vmem:[#allocation10 + $0x114] sm:$0xf0] }
  0xdf   :  { %v444_v59 = vmul.f32 %v4777_v51, %v4777_v51  ;;  %1048 = vmatpush.bf16.msrb.mxu1 %v3255_v61  ;;  %v4086_v61 = vld [vmem:[#allocation10 + $0x214] sm:$0xf]  ;;  %v3304_v42 = vld [vmem:[#allocation10 + $0x21c] sm:$0xf0]  ;;  %v3292_v17 = vld [vmem:[#allocation10 + $0x204] sm:$0xf0] }
  0xe0   :  { %v429_v60 = vadd.f32 %v428_v52, %v427_v41  ;;  %v446_v0 = vrot.slane %v443_v55, 4  ;;  %1061 = vmatpush.bf16.msrb.mxu2 %v3067_v1  ;;  %v3226_v52 = vld [vmem:[#allocation10 + $0x170] sm:$0xf]  ;;  %v3307_v1 = vor.u32 %v4086_v61, %v3304_v42  ;;  %v3202_v23 = vld [vmem:[#allocation10 + $0x140] sm:$0xf] }
  0xe1   :  { %v452_v3 = vrot.slane %v444_v59, 4  ;;  %v3227_v57 = vor.u32 %v4067_v53, %v3226_v52  ;;  %v3280_v29 = vld [vmem:[#allocation10 + $0x1ec] sm:$0xf0]  ;;  %v3256_v61 = vld [vmem:[#allocation10 + $0x1bc] sm:$0xf0] }
  0xe2   :  { %v439_v5 = vmul.f32 %v4768_v20, %v429_v60  ;;  %v447_v8 = vadd.f32 %v446_v0, %v443_v55  ;;  %1072 = vmatpush.bf16.msrb.mxu3 %v3187_v44  ;;  %v3175_v60 = vor.u32 %v4053_v36, %v3172_v58  ;;  %v4055_v36 = vld [vmem:[#allocation10 + $0x118] sm:$0xf0]  ;;  %v3070_v42 = vld [vmem:[#allocation10 + $0x38] sm:$0xf]  ;;  %v4052_v2 = vld [vmem:[#allocation10 + $0x100] sm:$0xf0] }
  0xe3   :  { %v453_v13 = vadd.f32 %v452_v3, %v444_v59  ;;  %1049 = vmatpush.bf16.msrb.mxu1 %v3243_v15  ;;  %v3214_v3 = vld [vmem:[#allocation10 + $0x158] sm:$0xf]  ;;  %v4083_v15 = vld [vmem:[#allocation10 + $0x1fc] sm:$0xf] }
  0xe4   :  { %v4785_v14 = vsub.f32 %v4762_v4, %v439_v5  ;;  %v448_v21 = vrot.slane %v447_v8, 2  ;;  %1062 = vmatpush.bf16.msrb.mxu2 %v3055_v22  ;;  %v3135_v4 = vor.u32 %v4045_v27, %v3134_v26  ;;  %v4064_v5 = vld [vmem:[#allocation10 + $0x160] sm:$0xf0]  ;;  %v3295_v22 = vor.u32 %v4083_v15, %v3292_v17  ;;  %v3058_v15 = vld [vmem:[#allocation10 + $0x20] sm:$0xf] }
  0xe5   :  { %v454_v24 = vrot.slane %v453_v13, 2  ;;  %v3107_v26 = vor.u32 %v4037_v19, %v3106_v18  ;;  %v4025_v17 = vld [vmem:[#allocation10 + $0x28] sm:$0xf0] }
  0xe6   :  { %v445_v25 = vmul.f32 %v4785_v14, %v4785_v14  ;;  %v449_v28 = vadd.f32 %v448_v21, %v447_v8  ;;  %1037 = vmatpush.bf16.msrb.mxu0 %v3135_v4  ;;  %v3215_v8 = vor.u32 %v4064_v5, %v3214_v3  ;;  %1073 = vmatpush.bf16.msrb.mxu3 %v3175_v60  ;;  %v4080_v4 = vld [vmem:[#allocation10 + $0x1e4] sm:$0xf]  ;;  %v4074_v60 = vld [vmem:[#allocation10 + $0x1b4] sm:$0xf] }
  0xe7   :  { %v455_v32 = vadd.f32 %v454_v24, %v453_v13  ;;  %1050 = vmatpush.bf16.msrb.mxu1 %v3231_v34  ;;  %v3163_v13 = vor.u32 %v4050_v9, %v3160_v10  ;;  %v4061_v24 = vld [vmem:[#allocation10 + $0x148] sm:$0xf0]  ;;  %v3190_v34 = vld [vmem:[#allocation10 + $0x128] sm:$0xf]  ;;  %v3283_v16 = vor.u32 %v4080_v4, %v3280_v29  ;;  %v4068_v4 = vld [vmem:[#allocation10 + $0x184] sm:$0xf] }
  0xe8   :  { %v458_v33 = vrot.slane %v445_v25, 4  ;;  %v450_v37 = vrot.slane %v449_v28, 1  ;;  %1063 = vmatpush.bf16.msrb.mxu2 %v3043_v38  ;;  %v3203_v27 = vor.u32 %v4061_v24, %v3202_v23  ;;  %v3191_v39 = vor.u32 %v4058_v35, %v3190_v34  ;;  %v4049_v23 = vld [vmem:[#allocation10 + $0xe8] sm:$0xf0]  ;;  %v3232_v29 = vld [vmem:[#allocation10 + $0x18c] sm:$0xf0] }
  0xe9   :  { %v456_v41 = vrot.slane %v455_v32, 1  ;;  %v3142_v34 = vld [vmem:[#allocation10 + $0xc8] sm:$0xf] }
  0xea   :  { %v459_v43 = vadd.f32 %v458_v33, %v445_v25  ;;  %v451_v48 = vadd.f32 %v450_v37, %v449_v28  ;;  %1082 = vmatpush.bf16.msra.mxu0 %v3319_v49  ;;  %v4047_v25 = vld [vmem:[#allocation10 + $0xdc] sm:$0xf]  ;;  %v3148_v28 = vld [vmem:[#allocation10 + $0xe4] sm:$0xf0]  ;;  %1074 = vmatpush.bf16.msrb.mxu3 %v3163_v13  ;;  %v4034_v33 = vld [vmem:[#allocation10 + $0x70] sm:$0xf0] }
  0xeb   :  { %v457_v54 = vadd.f32 %v456_v41, %v455_v32  ;;  %1095 = vmatpush.bf16.msra.mxu1 %v3131_v56  ;;  %v3151_v31 = vor.u32 %v4047_v25, %v3148_v28  ;;  %v3094_v32 = vld [vmem:[#allocation10 + $0x68] sm:$0xf]  ;;  %v4044_v41 = vld [vmem:[#allocation10 + $0xc4] sm:$0xf]  ;;  %v3082_v49 = vld [vmem:[#allocation10 + $0x50] sm:$0xf]  ;;  %v3059_v25 = vor.u32 %v4025_v17, %v3058_v15 }
  0xec   :  { %v460_v55 = vrot.slane %v459_v43, 2  ;;  %v464_v59 = vmul.f32 %v451_v48, %v4768_v20  ;;  %1108 = vmatpush.bf16.msra.mxu2 %v3227_v57  ;;  %v3095_v38 = vor.u32 %v4034_v33, %v3094_v32  ;;  %v3268_v48 = vld [vmem:[#allocation10 + $0x1d4] sm:$0xf0]  ;;  %v3244_v13 = vld [vmem:[#allocation10 + $0x1a4] sm:$0xf0]  ;;  %v3235_v33 = vor.u32 %v4068_v4, %v3232_v29 }
  0xed   :  { %v465_v63 = vmul.f32 %v457_v54, %v4768_v20  ;;  %v3271_v53 = vor.u32 %v4077_v46, %v3268_v48  ;;  %v4031_v54 = vld [vmem:[#allocation10 + $0x58] sm:$0xf0]  ;;  %v4022_v32 = vld [vmem:[#allocation10 + $0x10] sm:$0xf0]  ;;  %v3274_v17 = vld [vmem:[#allocation10 + $0x1d0] sm:$0xf] }
  0xee   :  { %v461_v0 = vadd.f32 %v460_v55, %v459_v43  ;;  %v4791_v6 = vadd.f32 1e-05, %v464_v59  ;;  %1083 = vmatpush.bf16.msra.mxu0 %v3307_v1  ;;  %v3136_v43 = vld [vmem:[#allocation10 + $0xcc] sm:$0xf0]  ;;  %1075 = vmatpush.bf16.msrb.mxu3 %v3151_v31  ;;  %v3083_v57 = vor.u32 %v4031_v54, %v3082_v49  ;;  %v3166_v1 = vld [vmem:[#allocation10 + $0xf8] sm:$0xf] }
  0xef   :  { %v4793_v11 = vadd.f32 1e-05, %v465_v63  ;;  %1096 = vmatpush.bf16.msra.mxu1 %v3119_v7  ;;  %v3139_v52 = vor.u32 %v4044_v41, %v3136_v43  ;;  %v3178_v55 = vld [vmem:[#allocation10 + $0x110] sm:$0xf]  ;;  %v3071_v7 = vor.u32 %v4028_v62, %v3070_v42  ;;  %v3046_v31 = vld [vmem:[#allocation10 + $0x8] sm:$0xf] }
  0xf0   :  { %v462_v12 = vrot.slane %v461_v0, 1  ;;  %4280 = vrsqrt.f32 %v4791_v6  ;;  %1109 = vmatpush.bf16.msra.mxu2 %v3215_v8  ;;  %v3179_v59 = vor.u32 %v4055_v36, %v3178_v55  ;;  %v3167_v8 = vor.u32 %v4052_v2, %v3166_v1  ;;  %v3322_v42 = vld [vmem:[#allocation10 + $0x230] sm:$0xf]  ;;  %v4091_v62 = vld [vmem:[#allocation10 + $0x238] sm:$0xf0] }
  0xf1   :  { %4282 = vrsqrt.f32 %v4793_v11  ;;  %vm486_vm2 = vweird.f32 %v4793_v11  ;;  %vm476_vm7 = vweird.f32 %v4791_v6 }
  0xf2   :  { %v463_v21 = vadd.f32 %v462_v12, %v461_v0  ;;  %1084 = vmatpush.bf16.msra.mxu0 %v3295_v22  ;;  %1076 = vmatpush.bf16.msrb.mxu3 %v3139_v52  ;;  %v3259_v0 = vor.u32 %v4074_v60, %v3256_v61  ;;  %v4071_v12 = vld [vmem:[#allocation10 + $0x19c] sm:$0xf]  ;;  %v3154_v22 = vld [vmem:[#allocation10 + $0xe0] sm:$0xf] }
  0xf3   :  { %1097 = vmatpush.bf16.msra.mxu1 %v3107_v26  ;;  %v3155_v26 = vor.u32 %v4049_v23, %v3154_v22  ;;  %v4076_v22 = vld [vmem:[#allocation10 + $0x1c0] sm:$0xf0] }
  0xf4   :  { %v466_v30 = vmul.f32 %v463_v21, %v4768_v20  ;;  %1110 = vmatpush.bf16.msra.mxu2 %v3203_v27  ;;  %v3247_v21 = vor.u32 %v4071_v12, %v3244_v13  ;;  %v3286_v12 = vld [vmem:[#allocation10 + $0x1e8] sm:$0xf]  ;;  %v4082_v13 = vld [vmem:[#allocation10 + $0x1f0] sm:$0xf0] }
  0xf5   :  { %v3287_v15 = vor.u32 %v4082_v13, %v3286_v12  ;;  %v3238_v27 = vld [vmem:[#allocation10 + $0x188] sm:$0xf]  ;;  %v4162_v13 = vld [vmem:[#allocation13 + $0x230] sm:$0xf0] }
  0xf6   :  { %v4798_v37 = vadd.f32 1e-05, %v466_v30  ;;  %v4800_v40 = vpop.eup %4280  ;;  %1085 = vmatpush.bf16.msra.mxu0 %v3283_v16  ;;  %v4046_v16 = vld [vmem:[#allocation10 + $0xd0] sm:$0xf0] }
  0xf7   :  { %v4802_v44 = vpop.eup %4282  ;;  %v471_v45 = vmul.f32 %v4800_v40, %v4791_v6  ;;  %1098 = vmatpush.bf16.msra.mxu1 %v3095_v38  ;;  %vm477_vm5 = vweird.f32 %v4800_v40  ;;  %v3047_v38 = vor.u32 %v4022_v32, %v3046_v31 }
  0xf8   :  { %4284 = vrsqrt.f32 %v4798_v37  ;;  %v481_v50 = vmul.f32 %v4802_v44, %v4793_v11  ;;  %1111 = vmatpush.bf16.msra.mxu2 %v3191_v39  ;;  %vm487_vm1 = vweird.f32 %v4802_v44  ;;  %v3143_v39 = vor.u32 %v4046_v16, %v3142_v34  ;;  %vm478_vm10 = vmor %vm476_vm7, %vm477_vm5 }
  0xf9   :  { %v472_v56 = vmul.f32 %v4800_v40, %v471_v45  ;;  %vm4817_vm3 = vmor %vm486_vm2, %vm487_vm1  ;;  %vm496_vm6 = vweird.f32 %v4798_v37  ;;  %v410_v45 = vld [vmem:[#allocation7] sm:$0x7] }
  0xfa   :  { %v482_v58 = vmul.f32 %v4802_v44, %v481_v50  ;;  %1086 = vmatpush.bf16.msra.mxu0 %v3271_v53  ;;  %v411_v50 = vld [vmem:[#allocation8] sm:$0x7] }
  0xfb   :  { %v473_v5 = vmul.f32 0.5, %v472_v56  ;;  %1099 = vmatpush.bf16.msra.mxu1 %v3083_v57  ;;  %v522_v6 = vperm.slane %v411_v50, 0  ;;  %v523_v53 = vperm.slane %v411_v50, 1  ;;  %v524_v57 = vperm.slane %v411_v50, 2 }
  0xfc   :  { %v483_v63 = vmul.f32 0.5, %v482_v58  ;;  %1112 = vmatpush.bf16.msra.mxu2 %v3179_v59 }
  0xfd   :  { %v474_v24 = vsub.f32 1.5, %v473_v5 }
  0xfe   :  { %v4285_v3 = vpop.eup %4284  ;;  %v484_v9 = vsub.f32 1.5, %v483_v63  ;;  %1087 = vmatpush.bf16.msra.mxu0 %v3259_v0 }
  0xff   :  { %v491_v10 = vmul.f32 %v4285_v3, %v4798_v37  ;;  %1100 = vmatpush.bf16.msra.mxu1 %v3071_v7  ;;  %vm497_vm4 = vweird.f32 %v4285_v3  ;;  %v475_v35 = vmul.f32 %v4800_v40, %v474_v24  ;;  %v3323_v7 = vor.u32 %v4091_v62, %v3322_v42  ;;  %v3250_v24 = vld [vmem:[#allocation10 + $0x1a0] sm:$0xf]  ;;  %v4108_v42 = vld [vmem:[#allocation13 + $0x80] sm:$0xf0] }
 0x100   :  { %v485_v18 = vmul.f32 %v4802_v44, %v484_v9  ;;  %1113 = vmatpush.bf16.msra.mxu2 %v3167_v8  ;;  %vm498_vm8 = vmor %vm496_vm6, %vm497_vm4  ;;  %v3310_v8 = vld [vmem:[#allocation10 + $0x218] sm:$0xf]  ;;  %v4088_v9 = vld [vmem:[#allocation10 + $0x220] sm:$0xf0] }
 0x101   :  { %v492_v19 = vmul.f32 %v4285_v3, %v491_v10  ;;  %v479_v46 = vsel %vm478_vm10, %v4800_v40, %v475_v35 }
 0x102   :  { %v489_v30 = vsel %vm4817_vm3, %v4802_v44, %v485_v18  ;;  %1088 = vmatpush.bf16.msra.mxu0 %v3247_v21  ;;  %v4079_v18 = vld [vmem:[#allocation10 + $0x1d8] sm:$0xf0]  ;;  %v3262_v21 = vld [vmem:[#allocation10 + $0x1b8] sm:$0xf] }
 0x103   :  { %v493_v28 = vmul.f32 0.5, %v492_v19  ;;  %1101 = vmatpush.bf16.msra.mxu1 %v3059_v25  ;;  %v503_v43 = vrot.slane %v489_v30, 7  ;;  %v3275_v19 = vor.u32 %v4079_v18, %v3274_v17  ;;  %v3263_v23 = vor.u32 %v4076_v22, %v3262_v21  ;;  %v4073_v25 = vld [vmem:[#allocation10 + $0x1a8] sm:$0xf0]  ;;  %v3412_v18 = vld [vmem:[#allocation13 + $0xb4] sm:$0xf0] }
 0x104   :  { %1114 = vmatpush.bf16.msra.mxu2 %v3155_v26  ;;  %v3251_v26 = vor.u32 %v4073_v25, %v3250_v24  ;;  %v4102_v24 = vld [vmem:[#allocation13 + $0x50] sm:$0xf0] }
 0x105   :  { %v494_v11 = vsub.f32 1.5, %v493_v28  ;;  %v506_v49 = vsel %vm505_vm9, %v479_v46, %v503_v43  ;;  %v4070_v28 = vld [vmem:[#allocation10 + $0x190] sm:$0xf0] }
 0x106   :  { %1089 = vmatpush.bf16.msra.mxu0 %v3235_v33  ;;  %v3239_v4 = vor.u32 %v4070_v28, %v3238_v27  ;;  %v4135_v27 = vld [vmem:[#allocation13 + $0x158] sm:$0xf0]  ;;  %v3590_v28 = vld [vmem:[#allocation13 + $0x210] sm:$0xf] }
 0x107   :  { %v495_v41 = vmul.f32 %v4285_v3, %v494_v11  ;;  %1102 = vmatpush.bf16.msra.mxu1 %v3047_v38 }
 0x108   :  { %1115 = vmatpush.bf16.msra.mxu2 %v3143_v39 }
 0x109   :  { %v499_v44 = vsel %vm498_vm8, %v4285_v3, %v495_v41 }
 0x10a   :  { %v504_v48 = vrot.slane %v499_v44, 6 }
 0x10c   :  { %v508_v37 = vsel %vm507_vm11, %v506_v49, %v504_v48  ;;  %v3410_v48 = vld [vmem:[#allocation13 + $0xa8] sm:$0xf]  ;;  %v4114_v49 = vld [vmem:[#allocation13 + $0xb0] sm:$0xf0] }
 0x10d   :  { %v510_v52 = vmul.f32 %v508_v37, %v410_v45  ;;  %v3411_v50 = vor.u32 %v4114_v49, %v3410_v48 }
 0x10f   :  { %v514_v54 = vperm.slane %v510_v52, 2  ;;  %v512_v55 = vperm.slane %v510_v52, 0  ;;  %v513_v56 = vperm.slane %v510_v52, 1 }
 0x111   :  { %v520_v36 = vmul.f32 %v514_v54, %v4785_v14  ;;  %v518_v58 = vmul.f32 %v512_v55, %v4774_v47  ;;  %v519_v40 = vmul.f32 %v513_v56, %v4777_v51  ;;  %v3311_v47 = vor.u32 %v4088_v9, %v3310_v8  ;;  %v3298_v51 = vld [vmem:[#allocation10 + $0x200] sm:$0xf]  ;;  %v4085_v14 = vld [vmem:[#allocation10 + $0x208] sm:$0xf0] }
 0x112   :  { %v3299_v10 = vor.u32 %v4085_v14, %v3298_v51  ;;  %v3506_v9 = vld [vmem:[#allocation13 + $0x168] sm:$0xf] }
 0x113   :  { %v528_v59 = vadd.f32 %v522_v6, %v518_v58  ;;  %v529_v60 = vadd.f32 %v523_v53, %v519_v40  ;;  %v530_v61 = vadd.f32 %v524_v57, %v520_v36  ;;  %v3398_v6 = vld [vmem:[#allocation13 + $0x90] sm:$0xf]  ;;  %v4111_v53 = vld [vmem:[#allocation13 + $0x98] sm:$0xf0]  ;;  %v3602_v51 = vld [vmem:[#allocation13 + $0x228] sm:$0xf] }
 0x114   :  { %v3399_v55 = vor.u32 %v4111_v53, %v3398_v6  ;;  %v3603_v17 = vor.u32 %v4162_v13, %v3602_v51  ;;  %v3388_v6 = vld [vmem:[#allocation13 + $0x84] sm:$0xf0]  ;;  %v4126_v13 = vld [vmem:[#allocation13 + $0x110] sm:$0xf0] }
 0x115   :  { %v531_v63 = vmax.f32 %v528_v59, 0.0  ;;  %v532_v0 = vmax.f32 %v529_v60, 0.0  ;;  %v533_v1 = vmax.f32 %v530_v61, 0.0  ;;  %v3386_v61 = vld [vmem:[#allocation13 + $0x78] sm:$0xf] }
 0x116   :  { %v3387_v62 = vor.u32 %v4108_v42, %v3386_v61  ;;  %v3470_v61 = vld [vmem:[#allocation13 + $0x120] sm:$0xf] }
 0x117   :  { %v534_v2 = vpack.c.bf16 %v531_v63, %v531_v63  ;;  %v535_v3 = vpack.c.bf16 %v532_v0, %v532_v0  ;;  %v536_v5 = vpack.c.bf16 %v533_v1, %v533_v1 }
 0x119   :  { %1025 = vmatmul.bf16.vlgmr.msra.gmra.mxu3 %v534_v2  ;;  %1038 = vmatmul.bf16.vlgmr.msrb.gmra.mxu0 %v535_v3 }
 0x11a   :  { %1051 = vmatmul.bf16.vlgmr.msrb.gmra.mxu1 %v536_v5  ;;  %1064 = vmatmul.bf16.vlgmr.msrb.gmra.mxu2 %v534_v2 }
 0x11b   :  { %1121 = vmatpush.bf16.msra.mxu3 %v3323_v7  ;;  %1732 = vmatpush.bf16.msrb.mxu0 %v3411_v50 }
 0x11c   :  { %1758 = vmatpush.bf16.msrb.mxu2 %v3603_v17 }
 0x11f   :  { %1122 = vmatpush.bf16.msra.mxu3 %v3311_v47  ;;  %1733 = vmatpush.bf16.msrb.mxu0 %v3399_v55  ;;  %v4138_v47 = vld [vmem:[#allocation13 + $0x170] sm:$0xf0] }
 0x120   :  { %v3507_v12 = vor.u32 %v4138_v47, %v3506_v9  ;;  %v4093_v9 = vld [vmem:[#allocation13 + $0x8] sm:$0xf0] }
 0x122   :  { %1745 = vmatpush.bf16.msrb.mxu1 %v3507_v12  ;;  %v3458_v12 = vld [vmem:[#allocation13 + $0x108] sm:$0xf] }
 0x123   :  { %1123 = vmatpush.bf16.msra.mxu3 %v3299_v10  ;;  %1734 = vmatpush.bf16.msrb.mxu0 %v3387_v62  ;;  %v4129_v62 = vld [vmem:[#allocation13 + $0x128] sm:$0xf0] }
 0x127   :  { %1124 = vmatpush.bf16.msra.mxu3 %v3287_v15  ;;  %v4113_v15 = vld [vmem:[#allocation13 + $0xac] sm:$0xf] }
 0x128   :  { %v3415_v22 = vor.u32 %v4113_v15, %v3412_v18  ;;  %v3459_v18 = vor.u32 %v4126_v13, %v3458_v12  ;;  %v3328_v12 = vld [vmem:[#allocation13 + $0xc] sm:$0xf0] }
 0x129   :  { %1077 = vmatmul.bf16.vlgmr.msrb.gmra.mxu3 %v535_v3  ;;  %1090 = vmatmul.bf16.vlgmr.msra.gmra.mxu0 %v536_v5 }
 0x12a   :  { %1103 = vmatmul.bf16.vlgmr.msra.gmra.mxu1 %v534_v2  ;;  %1116 = vmatmul.bf16.vlgmr.msra.gmra.mxu2 %v535_v3  ;;  %v3374_v3 = vld [vmem:[#allocation13 + $0x60] sm:$0xf] }
 0x12b   :  { %1125 = vmatpush.bf16.msra.mxu3 %v3275_v19 }
 0x12f   :  { %1126 = vmatpush.bf16.msra.mxu3 %v3263_v23  ;;  %v3362_v23 = vld [vmem:[#allocation13 + $0x48] sm:$0xf] }
 0x130   :  { %v3363_v25 = vor.u32 %v4102_v24, %v3362_v23 }
 0x133   :  { %1127 = vmatpush.bf16.msra.mxu3 %v3251_v26  ;;  %v3494_v26 = vld [vmem:[#allocation13 + $0x150] sm:$0xf] }
 0x137   :  { %1128 = vmatpush.bf16.msra.mxu3 %v3239_v4 }
 0x13a   :  { %1129 = vmatmul.bf16.vlgmr.msra.gmra.mxu3 %v536_v5  ;;  %v4105_v5 = vld [vmem:[#allocation13 + $0x68] sm:$0xf0] }
 0x13b   :  { %v3375_v8 = vor.u32 %v4105_v5, %v3374_v3  ;;  %1771 = vmatpush.bf16.msrb.mxu3 %v3415_v22  ;;  %v3376_v3 = vld [vmem:[#allocation13 + $0x6c] sm:$0xf0]  ;;  %v4101_v22 = vld [vmem:[#allocation13 + $0x4c] sm:$0xf] }
 0x13d   :  { %1735 = vmatpush.bf16.msrb.mxu0 %v3375_v8  ;;  %v3326_v8 = vld [vmem:[#allocation13] sm:$0xf] }
 0x141   :  { %1736 = vmatpush.bf16.msrb.mxu0 %v3363_v25  ;;  %v3364_v25 = vld [vmem:[#allocation13 + $0x54] sm:$0xf0] }
 0x196   :  { %v1039_v29 = vpop.f32.mrf.mxu0 }
 0x197   :  { %v1052_v30 = vpop.f32.mrf.mxu1 }
 0x19c   :  { %v1026_v31 = vpop.f32.mrf.mxu3 }
 0x19d   :  { %v1040_v32 = vadd.f32 %v1039_v29, %v1026_v31  ;;  %v1065_v11 = vpop.f32.mrf.mxu2  ;;  %v3495_v29 = vor.u32 %v4135_v27, %v3494_v26  ;;  %v4110_v31 = vld [vmem:[#allocation13 + $0x94] sm:$0xf]  ;;  %v4137_v26 = vld [vmem:[#allocation13 + $0x16c] sm:$0xf]  ;;  %v3508_v27 = vld [vmem:[#allocation13 + $0x174] sm:$0xf0] }
 0x19e   :  { %v1041_v33 = vpop.f32.mrf.mxu0 }
 0x19f   :  { %v1053_v34 = vadd.f32 %v1052_v30, %v1040_v32  ;;  %v1054_v16 = vpop.f32.mrf.mxu1  ;;  %v4159_v30 = vld [vmem:[#allocation13 + $0x218] sm:$0xf0]  ;;  %1746 = vmatpush.bf16.msrb.mxu1 %v3495_v29  ;;  %v3511_v29 = vor.u32 %v4137_v26, %v3508_v27  ;;  %v3514_v27 = vld [vmem:[#allocation13 + $0x170] sm:$0xf] }
 0x1a0   :  { %v3591_v32 = vor.u32 %v4159_v30, %v3590_v28 }
 0x1a1   :  { %v1136_v35 = vrot.slane %v1053_v34, 4 }
 0x1a2   :  { %1759 = vmatpush.bf16.msrb.mxu2 %v3591_v32  ;;  %v3446_v32 = vld [vmem:[#allocation13 + $0xf0] sm:$0xf] }
 0x1a3   :  { %v1137_v38 = vadd.f32 %v1136_v35, %v1053_v34  ;;  %v3350_v35 = vld [vmem:[#allocation13 + $0x30] sm:$0xf] }
 0x1a4   :  { %v1028_v39 = vpop.f32.mrf.mxu3 }
 0x1a5   :  { %v1138_v41 = vrot.slane %v1137_v38, 2  ;;  %v1067_v43 = vpop.f32.mrf.mxu2 }
 0x1a6   :  { %v1091_v44 = vpop.f32.mrf.mxu0  ;;  %v3482_v43 = vld [vmem:[#allocation13 + $0x138] sm:$0xf] }
 0x1a7   :  { %v1139_v45 = vadd.f32 %v1138_v41, %v1137_v38  ;;  %v4835_v46 = vpop.f32.mrf.mxu1  ;;  %v4099_v38 = vld [vmem:[#allocation13 + $0x38] sm:$0xf0] }
 0x1a8   :  { %v3351_v41 = vor.u32 %v4099_v38, %v3350_v35  ;;  %v4147_v35 = vld [vmem:[#allocation13 + $0x1b8] sm:$0xf0]  ;;  %v4098_v38 = vld [vmem:[#allocation13 + $0x34] sm:$0xf] }
 0x1a9   :  { %v1140_v37 = vrot.slane %v1139_v45, 1 }
 0x1aa   :  { %1737 = vmatpush.bf16.msrb.mxu0 %v3351_v41 }
 0x1ab   :  { %v1141_v52 = vadd.f32 %v1140_v37, %v1139_v45  ;;  %v3578_v45 = vld [vmem:[#allocation13 + $0x1f8] sm:$0xf]  ;;  %v4156_v37 = vld [vmem:[#allocation13 + $0x200] sm:$0xf0] }
 0x1ac   :  { %v1078_v54 = vpop.f32.mrf.mxu3 }
 0x1ad   :  { %v1154_v56 = vmul.f32 %v1141_v52, %v4768_v20  ;;  %v1079_v57 = vadd.f32 %v1078_v54, %v1065_v11  ;;  %v1117_v36 = vpop.f32.mrf.mxu2  ;;  %v3400_v11 = vld [vmem:[#allocation13 + $0x9c] sm:$0xf0]  ;;  %v4107_v52 = vld [vmem:[#allocation13 + $0x7c] sm:$0xf]  ;;  %v3579_v54 = vor.u32 %v4156_v37, %v3578_v45 }
 0x1ae   :  { %v1093_v58 = vpop.f32.mrf.mxu0  ;;  %v3403_v16 = vor.u32 %v4110_v31, %v3400_v11  ;;  %v1118_v39 = vadd.f32 %v1117_v36, %v4835_v46  ;;  %v3391_v55 = vor.u32 %v4107_v52, %v3388_v6  ;;  %v4123_v11 = vld [vmem:[#allocation13 + $0xf8] sm:$0xf0]  ;;  %v3496_v45 = vld [vmem:[#allocation13 + $0x15c] sm:$0xf0]  ;;  %v3434_v6 = vld [vmem:[#allocation13 + $0xd8] sm:$0xf] }
 0x1af   :  { %v4838_v40 = vsub.f32 %v1053_v34, %v1154_v56  ;;  %v4840_v59 = vadd.f32 %v1091_v44, %v1079_v57  ;;  %v1106_v60 = vpop.f32.mrf.mxu1  ;;  %v4132_v44 = vld [vmem:[#allocation13 + $0x140] sm:$0xf0]  ;;  %v3338_v56 = vld [vmem:[#allocation13 + $0x18] sm:$0xf]  ;;  %1760 = vmatpush.bf16.msrb.mxu2 %v3579_v54 }
 0x1b0   :  { %1772 = vmatpush.bf16.msrb.mxu3 %v3403_v16  ;;  %v3483_v50 = vor.u32 %v4132_v44, %v3482_v43  ;;  %v4096_v57 = vld [vmem:[#allocation13 + $0x20] sm:$0xf0]  ;;  %v3542_v16 = vld [vmem:[#allocation13 + $0x1b0] sm:$0xf]  ;;  %v3352_v43 = vld [vmem:[#allocation13 + $0x3c] sm:$0xf0] }
 0x1b1   :  { %v1160_v63 = vmul.f32 %v4838_v40, %v4838_v40  ;;  %v1142_v0 = vrot.slane %v4840_v59, 4  ;;  %v3339_v60 = vor.u32 %v4096_v57, %v3338_v56  ;;  %v3543_v41 = vor.u32 %v4147_v35, %v3542_v16  ;;  %v4134_v44 = vld [vmem:[#allocation13 + $0x154] sm:$0xf]  ;;  %v4120_v54 = vld [vmem:[#allocation13 + $0xe0] sm:$0xf0] }
 0x1b2   :  { %1747 = vmatpush.bf16.msrb.mxu1 %v3483_v50  ;;  %v3499_v50 = vor.u32 %v4134_v44, %v3496_v45  ;;  %v3435_v57 = vor.u32 %v4120_v54, %v3434_v6  ;;  %v4112_v16 = vld [vmem:[#allocation13 + $0xa0] sm:$0xf0]  ;;  %v4122_v44 = vld [vmem:[#allocation13 + $0xf4] sm:$0xf] }
 0x1b3   :  { %v1163_v1 = vrot.slane %v1160_v63, 4  ;;  %v1143_v2 = vadd.f32 %v1142_v0, %v4840_v59  ;;  %1738 = vmatpush.bf16.msrb.mxu0 %v3339_v60  ;;  %v3340_v60 = vld [vmem:[#allocation13 + $0x24] sm:$0xf0] }
 0x1b4   :  { %v1080_v7 = vpop.f32.mrf.mxu3  ;;  %1773 = vmatpush.bf16.msrb.mxu3 %v3391_v55  ;;  %v3530_v55 = vld [vmem:[#allocation13 + $0x198] sm:$0xf] }
 0x1b5   :  { %v1144_v14 = vrot.slane %v1143_v2, 2  ;;  %v1119_v10 = vpop.f32.mrf.mxu2  ;;  %v1164_v19 = vadd.f32 %v1163_v1, %v1160_v63  ;;  %v3566_v63 = vld [vmem:[#allocation13 + $0x1e0] sm:$0xf]  ;;  %v4153_v1 = vld [vmem:[#allocation13 + $0x1e8] sm:$0xf0] }
 0x1b6   :  { %v3567_v7 = vor.u32 %v4153_v1, %v3566_v63  ;;  %v3327_v10 = vor.u32 %v4093_v9, %v3326_v8  ;;  %v4131_v63 = vld [vmem:[#allocation13 + $0x13c] sm:$0xf]  ;;  %v3518_v9 = vld [vmem:[#allocation13 + $0x180] sm:$0xf] }
 0x1b7   :  { %v1145_v21 = vadd.f32 %v1144_v14, %v1143_v2  ;;  %v1165_v33 = vrot.slane %v1164_v19, 2  ;;  %v4104_v2 = vld [vmem:[#allocation13 + $0x64] sm:$0xf] }
 0x1b8   :  { %v3379_v14 = vor.u32 %v4104_v2, %v3376_v3  ;;  %1761 = vmatpush.bf16.msrb.mxu2 %v3567_v7  ;;  %1739 = vmatpush.bf16.msrb.mxu0 %v3327_v10  ;;  %v4117_v7 = vld [vmem:[#allocation13 + $0xc8] sm:$0xf0]  ;;  %v4092_v10 = vld [vmem:[#allocation13 + $0x4] sm:$0xf] }
 0x1b9   :  { %v1146_v4 = vrot.slane %v1145_v21, 1  ;;  %v1166_v36 = vadd.f32 %v1165_v33, %v1164_v19  ;;  %v3554_v19 = vld [vmem:[#allocation13 + $0x1c8] sm:$0xf]  ;;  %v3331_v13 = vor.u32 %v4092_v10, %v3328_v12 }
 0x1ba   :  { %1774 = vmatpush.bf16.msrb.mxu3 %v3379_v14 }
 0x1bb   :  { %v1147_v34 = vadd.f32 %v1146_v4, %v1145_v21  ;;  %v1167_v47 = vrot.slane %v1166_v36, 1  ;;  %v4150_v21 = vld [vmem:[#allocation13 + $0x1d0] sm:$0xf0]  ;;  %v3367_v4 = vor.u32 %v4101_v22, %v3364_v25  ;;  %v3604_v22 = vld [vmem:[#allocation13 + $0x234] sm:$0xf0] }
 0x1bc   :  { %v3555_v24 = vor.u32 %v4150_v21, %v3554_v19  ;;  %1784 = vmatpush.bf16.msra.mxu0 %v3511_v29 }
 0x1bd   :  { %v1155_v48 = vmul.f32 %v1147_v34, %v4768_v20  ;;  %v1130_v49 = vpop.f32.mrf.mxu3  ;;  %v1168_v30 = vadd.f32 %v1167_v47, %v1166_v36  ;;  %v3447_v34 = vor.u32 %v4123_v11, %v3446_v32  ;;  %v4144_v36 = vld [vmem:[#allocation13 + $0x1a0] sm:$0xf0]  ;;  %v4141_v47 = vld [vmem:[#allocation13 + $0x188] sm:$0xf0]  ;;  %v4158_v32 = vld [vmem:[#allocation13 + $0x214] sm:$0xf] }
 0x1be   :  { %v4848_v53 = vadd.f32 %v1130_v49, %v1118_v39  ;;  %1762 = vmatpush.bf16.msrb.mxu2 %v3555_v24  ;;  %1775 = vmatpush.bf16.msrb.mxu3 %v3367_v4  ;;  %v3355_v49 = vor.u32 %v4098_v38, %v3352_v43  ;;  %v3519_v14 = vor.u32 %v4141_v47, %v3518_v9  ;;  %v4115_v24 = vld [vmem:[#allocation13 + $0xb8] sm:$0xf0]  ;;  %v4125_v4 = vld [vmem:[#allocation13 + $0x10c] sm:$0xf]  ;;  %v4136_v43 = vld [vmem:[#allocation13 + $0x160] sm:$0xf0] }
 0x1bf   :  { %v4851_v46 = vsub.f32 %v4840_v59, %v1155_v48  ;;  %v3471_v59 = vor.u32 %v4129_v62, %v3470_v61  ;;  %v1181_v37 = vmul.f32 %v1168_v30, %v4768_v20 }
 0x1c0   :  { %v1148_v58 = vrot.slane %v4848_v53, 4  ;;  %1785 = vmatpush.bf16.msra.mxu0 %v3499_v50  ;;  %v4155_v50 = vld [vmem:[#allocation13 + $0x1fc] sm:$0xf] }
 0x1c1   :  { %v1161_v42 = vmul.f32 %v4851_v46, %v4851_v46  ;;  %1748 = vmatpush.bf16.msrb.mxu1 %v3471_v59  ;;  %v4863_v2 = vadd.f32 1e-05, %v1181_v37  ;;  %v3580_v37 = vld [vmem:[#allocation13 + $0x204] sm:$0xf0] }
 0x1c2   :  { %v1149_v0 = vadd.f32 %v1148_v58, %v4848_v53  ;;  %1763 = vmatpush.bf16.msrb.mxu2 %v3543_v41  ;;  %v4095_v58 = vld [vmem:[#allocation13 + $0x1c] sm:$0xf]  ;;  %1776 = vmatpush.bf16.msrb.mxu3 %v3355_v49  ;;  %v3502_v41 = vld [vmem:[#allocation13 + $0x158] sm:$0xf]  ;;  %v3448_v49 = vld [vmem:[#allocation13 + $0xfc] sm:$0xf0] }
 0x1c3   :  { %v1169_v5 = vrot.slane %v1161_v42, 4  ;;  %v3343_v62 = vor.u32 %v4095_v58, %v3340_v60  ;;  %v3451_v54 = vor.u32 %v4122_v44, %v3448_v49  ;;  %v3490_v58 = vld [vmem:[#allocation13 + $0x140] sm:$0xf]  ;;  %v4133_v60 = vld [vmem:[#allocation13 + $0x148] sm:$0xf0]  ;;  %vm1193_vm2 = vweird.f32 %v4863_v2 }
 0x1c4   :  { %v1150_v51 = vrot.slane %v1149_v0, 2 }
 0x1c5   :  { %v1170_v15 = vadd.f32 %v1169_v5, %v1161_v42  ;;  %v1132_v17 = vpop.f32.mrf.mxu3  ;;  %1749 = vmatpush.bf16.msrb.mxu1 %v3459_v18  ;;  %v3531_v42 = vor.u32 %v4144_v36, %v3530_v55  ;;  %v3422_v5 = vld [vmem:[#allocation13 + $0xc0] sm:$0xf]  ;;  %v4161_v18 = vld [vmem:[#allocation13 + $0x22c] sm:$0xf] }
 0x1c6   :  { %v1151_v23 = vadd.f32 %v1150_v51, %v1149_v0  ;;  %v3484_v0 = vld [vmem:[#allocation13 + $0x144] sm:$0xf0]  ;;  %1777 = vmatpush.bf16.msrb.mxu3 %v3343_v62  ;;  %v3472_v17 = vld [vmem:[#allocation13 + $0x12c] sm:$0xf0]  ;;  %v3607_v25 = vor.u32 %v4161_v18, %v3604_v22  ;;  %v3394_v55 = vld [vmem:[#allocation13 + $0x80] sm:$0xf]  ;;  %v3491_v62 = vor.u32 %v4133_v60, %v3490_v58 }
 0x1c7   :  { %v1171_v28 = vrot.slane %v1170_v15, 2  ;;  %v3487_v1 = vor.u32 %v4131_v63, %v3484_v0  ;;  %1764 = vmatpush.bf16.msrb.mxu2 %v3531_v42  ;;  %v4119_v63 = vld [vmem:[#allocation13 + $0xdc] sm:$0xf]  ;;  %v3436_v0 = vld [vmem:[#allocation13 + $0xe4] sm:$0xf0] }
 0x1c8   :  { %v1152_v31 = vrot.slane %v1151_v23, 1  ;;  %v3439_v47 = vor.u32 %v4119_v63, %v3436_v0  ;;  %v4121_v58 = vld [vmem:[#allocation13 + $0xe8] sm:$0xf0]  ;;  %v4140_v0 = vld [vmem:[#allocation13 + $0x184] sm:$0xf] }
 0x1c9   :  { %v1172_v33 = vadd.f32 %v1171_v28, %v1170_v15  ;;  %1750 = vmatpush.bf16.msrb.mxu1 %v3447_v34  ;;  %1786 = vmatpush.bf16.msra.mxu0 %v3487_v1  ;;  %v4128_v15 = vld [vmem:[#allocation13 + $0x124] sm:$0xf]  ;;  %v4139_v28 = vld [vmem:[#allocation13 + $0x178] sm:$0xf0]  ;;  %v3406_v34 = vld [vmem:[#allocation13 + $0x98] sm:$0xf] }
 0x1ca   :  { %v1153_v39 = vadd.f32 %v1152_v31, %v1151_v23  ;;  %v3475_v21 = vor.u32 %v4128_v15, %v3472_v17  ;;  %v3418_v23 = vld [vmem:[#allocation13 + $0xb0] sm:$0xf]  ;;  %1778 = vmatpush.bf16.msrb.mxu3 %v3331_v13  ;;  %v3515_v30 = vor.u32 %v4139_v28, %v3514_v27  ;;  %v3460_v31 = vld [vmem:[#allocation13 + $0x114] sm:$0xf0]  ;;  %v4103_v27 = vld [vmem:[#allocation13 + $0x58] sm:$0xf0] }
 0x1cb   :  { %v1173_v48 = vrot.slane %v1172_v33, 1  ;;  %1765 = vmatpush.bf16.msrb.mxu2 %v3519_v14  ;;  %v3419_v26 = vor.u32 %v4115_v24, %v3418_v23  ;;  %v3463_v11 = vor.u32 %v4125_v4, %v3460_v31  ;;  %v4130_v14 = vld [vmem:[#allocation13 + $0x130] sm:$0xf0]  ;;  %v4149_v23 = vld [vmem:[#allocation13 + $0x1cc] sm:$0xf] }
 0x1cc   :  { %v1156_v52 = vmul.f32 %v1153_v39, %v4768_v20  ;;  %v3407_v39 = vor.u32 %v4112_v16, %v3406_v34  ;;  %v3556_v24 = vld [vmem:[#allocation13 + $0x1d4] sm:$0xf0]  ;;  %v3466_v28 = vld [vmem:[#allocation13 + $0x110] sm:$0xf]  ;;  %v4127_v4 = vld [vmem:[#allocation13 + $0x118] sm:$0xf0] }
 0x1cd   :  { %v1174_v56 = vadd.f32 %v1173_v48, %v1172_v33  ;;  %1751 = vmatpush.bf16.msrb.mxu1 %v3435_v57  ;;  %1787 = vmatpush.bf16.msra.mxu0 %v3475_v21  ;;  %v3592_v33 = vld [vmem:[#allocation13 + $0x21c] sm:$0xf0]  ;;  %v3503_v48 = vor.u32 %v4136_v43, %v3502_v41  ;;  %v3583_v57 = vor.u32 %v4155_v50, %v3580_v37  ;;  %v3424_v21 = vld [vmem:[#allocation13 + $0xcc] sm:$0xf0]  ;;  %v3358_v34 = vld [vmem:[#allocation13 + $0x38] sm:$0xf] }
 0x1ce   :  { %v4860_v61 = vsub.f32 %v4848_v53, %v1156_v52  ;;  %v3423_v53 = vor.u32 %v4117_v7, %v3422_v5  ;;  %1823 = vmatpush.bf16.msra.mxu3 %v3515_v30  ;;  %v3595_v38 = vor.u32 %v4158_v32, %v3592_v33  ;;  %v3568_v5 = vld [vmem:[#allocation13 + $0x1ec] sm:$0xf0]  ;;  %v3382_v7 = vld [vmem:[#allocation13 + $0x68] sm:$0xf]  ;;  %v3467_v31 = vor.u32 %v4127_v4, %v3466_v28  ;;  %v3544_v33 = vld [vmem:[#allocation13 + $0x1bc] sm:$0xf0] }
 0x1cf   :  { %v1182_v59 = vmul.f32 %v1174_v56, %v4768_v20  ;;  %1810 = vmatpush.bf16.msra.mxu2 %v3419_v26  ;;  %v4109_v56 = vld [vmem:[#allocation13 + $0x88] sm:$0xf0]  ;;  %v3559_v26 = vor.u32 %v4149_v23, %v3556_v24  ;;  %v4100_v16 = vld [vmem:[#allocation13 + $0x40] sm:$0xf0]  ;;  %v4143_v50 = vld [vmem:[#allocation13 + $0x19c] sm:$0xf] }
 0x1d0   :  { %v1162_v3 = vmul.f32 %v4860_v61, %v4860_v61  ;;  %v3395_v36 = vor.u32 %v4109_v56, %v3394_v55  ;;  %v4124_v41 = vld [vmem:[#allocation13 + $0x100] sm:$0xf0]  ;;  %v3532_v37 = vld [vmem:[#allocation13 + $0x1a4] sm:$0xf0]  ;;  %v3442_v55 = vld [vmem:[#allocation13 + $0xe0] sm:$0xf] }
 0x1d1   :  { %v4867_v8 = vadd.f32 1e-05, %v1182_v59  ;;  %1752 = vmatpush.bf16.msrb.mxu1 %v3423_v53  ;;  %1788 = vmatpush.bf16.msra.mxu0 %v3463_v11  ;;  %v4152_v59 = vld [vmem:[#allocation13 + $0x1e4] sm:$0xf]  ;;  %v4106_v53 = vld [vmem:[#allocation13 + $0x70] sm:$0xf0] }
 0x1d2   :  { %v1175_v51 = vrot.slane %v1162_v3, 4  ;;  %1824 = vmatpush.bf16.msra.mxu3 %v3503_v48  ;;  %v3571_v10 = vor.u32 %v4152_v59, %v3568_v5  ;;  %v3383_v12 = vor.u32 %v4106_v53, %v3382_v7  ;;  %v4146_v11 = vld [vmem:[#allocation13 + $0x1b4] sm:$0xf]  ;;  %v3520_v59 = vld [vmem:[#allocation13 + $0x18c] sm:$0xf0] }
 0x1d3   :  { %4286 = vrsqrt.f32 %v4867_v8  ;;  %1811 = vmatpush.bf16.msra.mxu2 %v3407_v39  ;;  %v3359_v39 = vor.u32 %v4100_v16, %v3358_v34  ;;  %vm1203_vm13 = vweird.f32 %v4867_v8  ;;  %v3334_v5 = vld [vmem:[#allocation13 + $0x8] sm:$0xf]  ;;  %v4094_v7 = vld [vmem:[#allocation13 + $0x10] sm:$0xf0] }
 0x1d4   :  { %v1176_v19 = vadd.f32 %v1175_v51, %v1162_v3  ;;  %4288 = vrsqrt.f32 %v4863_v2  ;;  %v3478_v51 = vld [vmem:[#allocation13 + $0x128] sm:$0xf] }
 0x1d5   :  { %1797 = vmatpush.bf16.msra.mxu1 %v3607_v25  ;;  %1789 = vmatpush.bf16.msra.mxu0 %v3451_v54  ;;  %v3479_v17 = vor.u32 %v4130_v14, %v3478_v51  ;;  %v3370_v25 = vld [vmem:[#allocation13 + $0x50] sm:$0xf]  ;;  %v4097_v54 = vld [vmem:[#allocation13 + $0x28] sm:$0xf0]  ;;  %v3430_v53 = vld [vmem:[#allocation13 + $0xc8] sm:$0xf] }
 0x1d6   :  { %v1177_v29 = vrot.slane %v1176_v19, 2  ;;  %1825 = vmatpush.bf16.msra.mxu3 %v3491_v62  ;;  %v3371_v30 = vor.u32 %v4103_v27, %v3370_v25  ;;  %v4118_v51 = vld [vmem:[#allocation13 + $0xd0] sm:$0xf0]  ;;  %v3526_v62 = vld [vmem:[#allocation13 + $0x188] sm:$0xf] }
 0x1d7   :  { %1812 = vmatpush.bf16.msra.mxu2 %v3395_v36 }
 0x1d8   :  { %v1178_v35 = vadd.f32 %v1177_v29, %v1176_v19  ;;  %v4116_v19 = vld [vmem:[#allocation13 + $0xc4] sm:$0xf] }
 0x1d9   :  { %v4871_v45 = vpop.eup %4286  ;;  %1798 = vmatpush.bf16.msra.mxu1 %v3595_v38  ;;  %1790 = vmatpush.bf16.msra.mxu0 %v3439_v47  ;;  %v3427_v22 = vor.u32 %v4116_v19, %v3424_v21  ;;  %v3547_v38 = vor.u32 %v4146_v11, %v3544_v33  ;;  %v3335_v47 = vor.u32 %v4094_v7, %v3334_v5  ;;  %v3610_v11 = vld [vmem:[#allocation13 + $0x230] sm:$0xf]  ;;  %v4163_v33 = vld [vmem:[#allocation13 + $0x238] sm:$0xf0] }
 0x1da   :  { %v1198_v52 = vmul.f32 %v4871_v45, %v4867_v8  ;;  %v1179_v6 = vrot.slane %v1178_v35, 1  ;;  %v4875_v1 = vpop.eup %4288  ;;  %1826 = vmatpush.bf16.msra.mxu3 %v3479_v17  ;;  %vm1204_vm12 = vweird.f32 %v4871_v45  ;;  %v3523_v8 = vor.u32 %v4140_v0, %v3520_v59  ;;  %v1134_v17 = vld [vmem:[%s5022_s5] sm:$0x7] }
 0x1db   :  { %v1188_v13 = vmul.f32 %v4875_v1, %v4863_v2  ;;  %1813 = vmatpush.bf16.msra.mxu2 %v3383_v12  ;;  %vm4889_vm14 = vmor %vm1203_vm13, %vm1204_vm12  ;;  %vm1194_vm0 = vweird.f32 %v4875_v1 }
 0x1dc   :  { %v1180_v42 = vadd.f32 %v1179_v6, %v1178_v35  ;;  %v1199_v3 = vmul.f32 %v4871_v45, %v1198_v52  ;;  %v3454_v35 = vld [vmem:[#allocation13 + $0xf8] sm:$0xf]  ;;  %v3346_v52 = vld [vmem:[#allocation13 + $0x20] sm:$0xf]  ;;  %vm1195_vm4 = vmor %vm1193_vm2, %vm1194_vm0 }
 0x1dd   :  { %1799 = vmatpush.bf16.msra.mxu1 %v3583_v57  ;;  %v1189_v29 = vmul.f32 %v4875_v1, %v1188_v13  ;;  %1791 = vmatpush.bf16.msra.mxu0 %v3427_v22  ;;  %v3455_v48 = vor.u32 %v4124_v41, %v3454_v35  ;;  %v3535_v57 = vor.u32 %v4143_v50, %v3532_v37  ;;  %v1135_v22 = vld [vmem:[#allocation11] sm:$0x7]  ;;  %v3574_v50 = vld [vmem:[#allocation13 + $0x1e8] sm:$0xf]  ;;  %v4154_v37 = vld [vmem:[#allocation13 + $0x1f0] sm:$0xf0] }
 0x1de   :  { %v1183_v9 = vmul.f32 %v1180_v42, %v4768_v20  ;;  %v1200_v18 = vmul.f32 0.5, %v1199_v3  ;;  %1827 = vmatpush.bf16.msra.mxu3 %v3467_v31  ;;  %v3347_v36 = vor.u32 %v4097_v54, %v3346_v52  ;;  %v3443_v42 = vor.u32 %v4121_v58, %v3442_v55  ;;  %v4151_v54 = vld [vmem:[#allocation13 + $0x1d8] sm:$0xf0]  ;;  %v3538_v58 = vld [vmem:[#allocation13 + $0x1a0] sm:$0xf] }
 0x1df   :  { %1814 = vmatpush.bf16.msra.mxu2 %v3371_v30  ;;  %v1190_v44 = vmul.f32 0.5, %v1189_v29  ;;  %v1237_v2 = vperm.slane %v1135_v22, 0  ;;  %v1238_v24 = vperm.slane %v1135_v22, 1  ;;  %v1239_v28 = vperm.slane %v1135_v22, 2 }
 0x1e0   :  { %v4881_v15 = vadd.f32 1e-05, %v1183_v9  ;;  %v1201_v32 = vsub.f32 1.5, %v1200_v18  ;;  %v3575_v52 = vor.u32 %v4154_v37, %v3574_v50  ;;  %v3700_v37 = vld [vmem:[#allocation16 + $0xb4] sm:$0xf0] }
 0x1e1   :  { %1800 = vmatpush.bf16.msra.mxu1 %v3571_v10  ;;  %v1191_v60 = vsub.f32 1.5, %v1190_v44  ;;  %v3431_v10 = vor.u32 %v4118_v51, %v3430_v53  ;;  %v3598_v44 = vld [vmem:[#allocation13 + $0x218] sm:$0xf] }
 0x1e2   :  { %4290 = vrsqrt.f32 %v4881_v15  ;;  %v1202_v6 = vmul.f32 %v4871_v45, %v1201_v32  ;;  %1828 = vmatpush.bf16.msra.mxu3 %v3455_v48  ;;  %vm1213_vm1 = vweird.f32 %v4881_v15  ;;  %v4160_v48 = vld [vmem:[#allocation13 + $0x220] sm:$0xf0] }
 0x1e3   :  { %1815 = vmatpush.bf16.msra.mxu2 %v3359_v39  ;;  %v1192_v14 = vmul.f32 %v4875_v1, %v1191_v60  ;;  %v4145_v60 = vld [vmem:[#allocation13 + $0x1a8] sm:$0xf0] }
 0x1e4   :  { %v1206_v3 = vsel %vm4889_vm14, %v4871_v45, %v1202_v6  ;;  %v3562_v6 = vld [vmem:[#allocation13 + $0x1d0] sm:$0xf] }
 0x1e5   :  { %1801 = vmatpush.bf16.msra.mxu1 %v3559_v26  ;;  %v1220_v45 = vrot.slane %v1206_v3, 7  ;;  %v1196_v18 = vsel %vm1195_vm4, %v4875_v1, %v1192_v14  ;;  %v3563_v55 = vor.u32 %v4151_v54, %v3562_v6  ;;  %v3698_v14 = vld [vmem:[#allocation16 + $0xa8] sm:$0xf] }
 0x1e6   :  { %1829 = vmatpush.bf16.msra.mxu3 %v3443_v42  ;;  %v3539_v42 = vor.u32 %v4145_v60, %v3538_v58  ;;  %v3650_v54 = vld [vmem:[#allocation16 + $0x48] sm:$0xf]  ;;  %v4207_v58 = vld [vmem:[#allocation16 + $0x158] sm:$0xf0] }
 0x1e7   :  { %1816 = vmatpush.bf16.msra.mxu2 %v3347_v36  ;;  %v1222_v21 = vsel %vm505_vm9, %v1196_v18, %v1220_v45 }
 0x1e8   :  { %v4291_v43 = vpop.eup %4290 }
 0x1e9   :  { %v1208_v49 = vmul.f32 %v4291_v43, %v4881_v15  ;;  %1802 = vmatpush.bf16.msra.mxu1 %v3547_v38  ;;  %vm1214_vm15 = vweird.f32 %v4291_v43 }
 0x1ea   :  { %vm1215_vm3 = vmor %vm1213_vm1, %vm1214_vm15  ;;  %1830 = vmatpush.bf16.msra.mxu3 %v3431_v10  ;;  %v4186_v10 = vld [vmem:[#allocation16 + $0xb0] sm:$0xf0] }
 0x1eb   :  { %v1209_v56 = vmul.f32 %v4291_v43, %v1208_v49  ;;  %1817 = vmatpush.bf16.msra.mxu2 %v3335_v47  ;;  %v3699_v45 = vor.u32 %v4186_v10, %v3698_v14 }
 0x1ed   :  { %v1210_v63 = vmul.f32 0.5, %v1209_v56  ;;  %1803 = vmatpush.bf16.msra.mxu1 %v3535_v57  ;;  %v3550_v56 = vld [vmem:[#allocation13 + $0x1b8] sm:$0xf]  ;;  %v4148_v57 = vld [vmem:[#allocation13 + $0x1c0] sm:$0xf0] }
 0x1ee   :  { %v3551_v36 = vor.u32 %v4148_v57, %v3550_v56 }
 0x1ef   :  { %v1211_v9 = vsub.f32 1.5, %v1210_v63  ;;  %v4142_v63 = vld [vmem:[#allocation13 + $0x190] sm:$0xf0] }
 0x1f0   :  { %v3527_v0 = vor.u32 %v4142_v63, %v3526_v62  ;;  %v3878_v62 = vld [vmem:[#allocation16 + $0x210] sm:$0xf]  ;;  %v4231_v63 = vld [vmem:[#allocation16 + $0x218] sm:$0xf0] }
 0x1f1   :  { %v1212_v12 = vmul.f32 %v4291_v43, %v1211_v9  ;;  %1804 = vmatpush.bf16.msra.mxu1 %v3523_v8 }
 0x1f3   :  { %v1216_v13 = vsel %vm1215_vm3, %v4291_v43, %v1212_v12  ;;  %v3611_v43 = vor.u32 %v4163_v33, %v3610_v11  ;;  %v3662_v33 = vld [vmem:[#allocation16 + $0x60] sm:$0xf] }
 0x1f4   :  { %v1221_v19 = vrot.slane %v1216_v13, 6 }
 0x1f6   :  { %v1223_v15 = vsel %vm507_vm11, %v1222_v21, %v1221_v19  ;;  %v3686_v19 = vld [vmem:[#allocation16 + $0x90] sm:$0xf]  ;;  %v4183_v21 = vld [vmem:[#allocation16 + $0x98] sm:$0xf0] }
 0x1f7   :  { %v1225_v23 = vmul.f32 %v1223_v15, %v1134_v17 }
 0x1f9   :  { %v1229_v25 = vperm.slane %v1225_v23, 2  ;;  %v1227_v26 = vperm.slane %v1225_v23, 0  ;;  %v1228_v27 = vperm.slane %v1225_v23, 1 }
 0x1fb   :  { %v1235_v4 = vmul.f32 %v1229_v25, %v4860_v61  ;;  %v1233_v29 = vmul.f32 %v1227_v26, %v4838_v40  ;;  %v1234_v1 = vmul.f32 %v1228_v27, %v4851_v46  ;;  %v3599_v40 = vor.u32 %v4160_v48, %v3598_v44  ;;  %v3586_v46 = vld [vmem:[#allocation13 + $0x200] sm:$0xf]  ;;  %v4157_v61 = vld [vmem:[#allocation13 + $0x208] sm:$0xf0]  ;;  %v3674_v27 = vld [vmem:[#allocation16 + $0x78] sm:$0xf] }
 0x1fc   :  { %v3587_v49 = vor.u32 %v4157_v61, %v3586_v46  ;;  %v3890_v44 = vld [vmem:[#allocation16 + $0x228] sm:$0xf]  ;;  %v4234_v46 = vld [vmem:[#allocation16 + $0x230] sm:$0xf0]  ;;  %v4185_v61 = vld [vmem:[#allocation16 + $0xac] sm:$0xf] }
 0x1fd   :  { %v1243_v30 = vadd.f32 %v1237_v2, %v1233_v29  ;;  %v1244_v31 = vadd.f32 %v1238_v24, %v1234_v1  ;;  %v1245_v32 = vadd.f32 %v1239_v28, %v1235_v4  ;;  %v3687_v2 = vor.u32 %v4183_v21, %v3686_v19  ;;  %v4180_v28 = vld [vmem:[#allocation16 + $0x80] sm:$0xf0]  ;;  %v3866_v19 = vld [vmem:[#allocation16 + $0x1f8] sm:$0xf] }
 0x1fe   :  { %v3675_v29 = vor.u32 %v4180_v28, %v3674_v27  ;;  %v3891_v50 = vor.u32 %v4234_v46, %v3890_v44  ;;  %v3703_v6 = vor.u32 %v4185_v61, %v3700_v37  ;;  %v4228_v21 = vld [vmem:[#allocation16 + $0x200] sm:$0xf0]  ;;  %v3626_v28 = vld [vmem:[#allocation16 + $0x18] sm:$0xf] }
 0x1ff   :  { %v1246_v34 = vmax.f32 %v1243_v30, 0.0  ;;  %v1247_v16 = vmax.f32 %v1244_v31, 0.0  ;;  %v1248_v35 = vmax.f32 %v1245_v32, 0.0 }
 0x201   :  { %v1249_v38 = vpack.c.bf16 %v1246_v34, %v1246_v34  ;;  %v1250_v39 = vpack.c.bf16 %v1247_v16, %v1247_v16  ;;  %v1251_v41 = vpack.c.bf16 %v1248_v35, %v1248_v35  ;;  %v4177_v34 = vld [vmem:[#allocation16 + $0x68] sm:$0xf0] }
 0x203   :  { %1740 = vmatmul.bf16.vlgmr.msrb.gmra.mxu0 %v1249_v38  ;;  %1753 = vmatmul.bf16.vlgmr.msrb.gmra.mxu1 %v1250_v39 }
 0x204   :  { %1766 = vmatmul.bf16.vlgmr.msrb.gmra.mxu2 %v1251_v41  ;;  %1779 = vmatmul.bf16.vlgmr.msrb.gmra.mxu3 %v1249_v38 }
 0x205   :  { %1836 = vmatpush.bf16.msrb.mxu0 %v3611_v43  ;;  %2447 = vmatpush.bf16.msrb.mxu1 %v3699_v45  ;;  %v4210_v43 = vld [vmem:[#allocation16 + $0x170] sm:$0xf0]  ;;  %v4204_v45 = vld [vmem:[#allocation16 + $0x140] sm:$0xf0] }
 0x206   :  { %2473 = vmatpush.bf16.msrb.mxu3 %v3891_v50  ;;  %v4198_v50 = vld [vmem:[#allocation16 + $0x110] sm:$0xf0] }
 0x209   :  { %1837 = vmatpush.bf16.msrb.mxu0 %v3599_v40  ;;  %2448 = vmatpush.bf16.msrb.mxu1 %v3687_v2  ;;  %v3676_v2 = vld [vmem:[#allocation16 + $0x84] sm:$0xf0] }
 0x20d   :  { %1838 = vmatpush.bf16.msrb.mxu0 %v3587_v49  ;;  %2449 = vmatpush.bf16.msrb.mxu1 %v3675_v29 }
 0x211   :  { %1839 = vmatpush.bf16.msrb.mxu0 %v3575_v52 }
 0x213   :  { %1792 = vmatmul.bf16.vlgmr.msra.gmra.mxu0 %v1250_v39  ;;  %1805 = vmatmul.bf16.vlgmr.msra.gmra.mxu1 %v1251_v41 }
 0x214   :  { %1818 = vmatmul.bf16.vlgmr.msra.gmra.mxu2 %v1249_v38  ;;  %1831 = vmatmul.bf16.vlgmr.msra.gmra.mxu3 %v1250_v39  ;;  %v3663_v39 = vor.u32 %v4177_v34, %v3662_v33  ;;  %v3854_v33 = vld [vmem:[#allocation16 + $0x1e0] sm:$0xf]  ;;  %v4225_v34 = vld [vmem:[#allocation16 + $0x1e8] sm:$0xf0] }
 0x215   :  { %1840 = vmatpush.bf16.msrb.mxu0 %v3563_v55  ;;  %v4174_v55 = vld [vmem:[#allocation16 + $0x50] sm:$0xf0] }
 0x216   :  { %2450 = vmatpush.bf16.msrb.mxu1 %v3663_v39  ;;  %v3651_v57 = vor.u32 %v4174_v55, %v3650_v54  ;;  %v3664_v39 = vld [vmem:[#allocation16 + $0x6c] sm:$0xf0]  ;;  %v3842_v54 = vld [vmem:[#allocation16 + $0x1c8] sm:$0xf]  ;;  %v4222_v55 = vld [vmem:[#allocation16 + $0x1d0] sm:$0xf0] }
 0x219   :  { %1841 = vmatpush.bf16.msrb.mxu0 %v3551_v36  ;;  %v3782_v36 = vld [vmem:[#allocation16 + $0x150] sm:$0xf] }
 0x21a   :  { %2451 = vmatpush.bf16.msrb.mxu1 %v3651_v57 }
 0x21d   :  { %1842 = vmatpush.bf16.msrb.mxu0 %v3539_v42  ;;  %v3783_v42 = vor.u32 %v4207_v58, %v3782_v36  ;;  %v3843_v36 = vor.u32 %v4222_v55, %v3842_v54  ;;  %v3652_v58 = vld [vmem:[#allocation16 + $0x54] sm:$0xf0] }
 0x221   :  { %1843 = vmatpush.bf16.msrb.mxu0 %v3527_v0  ;;  %v3879_v0 = vor.u32 %v4231_v63, %v3878_v62 }
 0x223   :  { %2474 = vmatpush.bf16.msrb.mxu3 %v3879_v0  ;;  %v3796_v0 = vld [vmem:[#allocation16 + $0x174] sm:$0xf0] }
 0x224   :  { %1844 = vmatmul.bf16.vlgmr.msrb.gmra.mxu0 %v1251_v41  ;;  %v3794_v41 = vld [vmem:[#allocation16 + $0x168] sm:$0xf] }
 0x225   :  { %v3795_v40 = vor.u32 %v4210_v43, %v3794_v41  ;;  %2486 = vmatpush.bf16.msra.mxu0 %v3703_v6 }
 0x227   :  { %2460 = vmatpush.bf16.msrb.mxu2 %v3795_v40  ;;  %v4165_v40 = vld [vmem:[#allocation16 + $0x8] sm:$0xf0] }
 0x22b   :  { %2461 = vmatpush.bf16.msrb.mxu2 %v3783_v42 }
 0x280   :  { %v1741_v59 = vpop.f32.mrf.mxu0  ;;  %v1754_v3 = vpop.f32.mrf.mxu1 }
 0x281   :  { %v1755_v5 = vadd.f32 %v1754_v3, %v1741_v59  ;;  %v4182_v59 = vld [vmem:[#allocation16 + $0x94] sm:$0xf]  ;;  %v3688_v3 = vld [vmem:[#allocation16 + $0x9c] sm:$0xf0] }
 0x287   :  { %v1767_v7 = vpop.f32.mrf.mxu2  ;;  %v1780_v53 = vpop.f32.mrf.mxu3 }
 0x288   :  { %v1768_v9 = vadd.f32 %v1767_v7, %v1755_v5  ;;  %v1743_v8 = vpop.f32.mrf.mxu0  ;;  %v1756_v47 = vpop.f32.mrf.mxu1 }
 0x289   :  { %v3691_v8 = vor.u32 %v4182_v59, %v3688_v3  ;;  %v3638_v47 = vld [vmem:[#allocation16 + $0x30] sm:$0xf] }
 0x28a   :  { %v1851_v51 = vrot.slane %v1768_v9, 4 }
 0x28b   :  { %2487 = vmatpush.bf16.msra.mxu0 %v3691_v8  ;;  %v3830_v8 = vld [vmem:[#allocation16 + $0x1b0] sm:$0xf] }
 0x28c   :  { %v1852_v12 = vadd.f32 %v1851_v51, %v1768_v9  ;;  %v4171_v51 = vld [vmem:[#allocation16 + $0x38] sm:$0xf0] }
 0x28d   :  { %v3639_v10 = vor.u32 %v4171_v51, %v3638_v47  ;;  %v4219_v47 = vld [vmem:[#allocation16 + $0x1b8] sm:$0xf0]  ;;  %v4170_v51 = vld [vmem:[#allocation16 + $0x34] sm:$0xf] }
 0x28e   :  { %v1853_v13 = vrot.slane %v1852_v12, 2 }
 0x28f   :  { %v1769_v17 = vpop.f32.mrf.mxu2  ;;  %v1782_v18 = vpop.f32.mrf.mxu3  ;;  %2452 = vmatpush.bf16.msrb.mxu1 %v3639_v10  ;;  %v3831_v10 = vor.u32 %v4219_v47, %v3830_v8 }
 0x290   :  { %v1854_v22 = vadd.f32 %v1853_v13, %v1852_v12  ;;  %v1793_v15 = vpop.f32.mrf.mxu0  ;;  %v1806_v23 = vpop.f32.mrf.mxu1  ;;  %v3770_v12 = vld [vmem:[#allocation16 + $0x138] sm:$0xf] }
 0x291   :  { %v1794_v24 = vadd.f32 %v1793_v15, %v1780_v53  ;;  %v3771_v18 = vor.u32 %v4204_v45, %v3770_v12  ;;  %v3640_v12 = vld [vmem:[#allocation16 + $0x3c] sm:$0xf0]  ;;  %v4206_v45 = vld [vmem:[#allocation16 + $0x154] sm:$0xf] }
 0x292   :  { %v1855_v25 = vrot.slane %v1854_v22, 1 }
 0x293   :  { %v4909_v26 = vadd.f32 %v1806_v23, %v1794_v24  ;;  %v3867_v23 = vor.u32 %v4228_v21, %v3866_v19  ;;  %2462 = vmatpush.bf16.msrb.mxu2 %v3771_v18  ;;  %v3643_v19 = vor.u32 %v4170_v51, %v3640_v12  ;;  %v3694_v51 = vld [vmem:[#allocation16 + $0x98] sm:$0xf] }
 0x294   :  { %v1856_v4 = vadd.f32 %v1855_v25, %v1854_v22  ;;  %v4179_v22 = vld [vmem:[#allocation16 + $0x7c] sm:$0xf] }
 0x295   :  { %v1857_v1 = vrot.slane %v4909_v26, 4  ;;  %v3679_v27 = vor.u32 %v4179_v22, %v3676_v2  ;;  %2475 = vmatpush.bf16.msrb.mxu3 %v3867_v23  ;;  %v3722_v23 = vld [vmem:[#allocation16 + $0xd8] sm:$0xf]  ;;  %v4192_v2 = vld [vmem:[#allocation16 + $0xe0] sm:$0xf0] }
 0x296   :  { %v1869_v30 = vmul.f32 %v1856_v4, %v4768_v20  ;;  %v4168_v4 = vld [vmem:[#allocation16 + $0x20] sm:$0xf0] }
 0x297   :  { %v1858_v31 = vadd.f32 %v1857_v1, %v4909_v26  ;;  %v1819_v32 = vpop.f32.mrf.mxu2  ;;  %v1832_v11 = vpop.f32.mrf.mxu3  ;;  %v3627_v1 = vor.u32 %v4168_v4, %v3626_v28  ;;  %2488 = vmatpush.bf16.msra.mxu0 %v3679_v27  ;;  %v3723_v28 = vor.u32 %v4192_v2, %v3722_v23  ;;  %v4216_v4 = vld [vmem:[#allocation16 + $0x1a0] sm:$0xf0]  ;;  %v4227_v23 = vld [vmem:[#allocation16 + $0x1fc] sm:$0xf]  ;;  %v3868_v2 = vld [vmem:[#allocation16 + $0x204] sm:$0xf0] }
 0x298   :  { %v4914_v16 = vsub.f32 %v1768_v9, %v1869_v30  ;;  %v1795_v35 = vpop.f32.mrf.mxu0  ;;  %v1808_v38 = vpop.f32.mrf.mxu1  ;;  %v1833_v14 = vadd.f32 %v1832_v11, %v1819_v32  ;;  %v3758_v30 = vld [vmem:[#allocation16 + $0x120] sm:$0xf] }
 0x299   :  { %v1859_v48 = vrot.slane %v1858_v31, 2  ;;  %v4176_v35 = vld [vmem:[#allocation16 + $0x64] sm:$0xf]  ;;  %2453 = vmatpush.bf16.msrb.mxu1 %v3627_v1  ;;  %v3855_v38 = vor.u32 %v4225_v34, %v3854_v33  ;;  %v3628_v1 = vld [vmem:[#allocation16 + $0x24] sm:$0xf0] }
 0x29a   :  { %v1875_v49 = vmul.f32 %v4914_v16, %v4914_v16  ;;  %v3667_v44 = vor.u32 %v4176_v35, %v3664_v39  ;;  %v3772_v33 = vld [vmem:[#allocation16 + $0x144] sm:$0xf0]  ;;  %v3710_v39 = vld [vmem:[#allocation16 + $0xc0] sm:$0xf] }
 0x29b   :  { %v1860_v52 = vadd.f32 %v1859_v48, %v1858_v31  ;;  %v4201_v31 = vld [vmem:[#allocation16 + $0x128] sm:$0xf0]  ;;  %v3614_v48 = vld [vmem:[#allocation16] sm:$0xf]  ;;  %2476 = vmatpush.bf16.msrb.mxu3 %v3855_v38 }
 0x29c   :  { %v1878_v56 = vrot.slane %v1875_v49, 4  ;;  %v3759_v11 = vor.u32 %v4201_v31, %v3758_v30  ;;  %v3615_v61 = vor.u32 %v4165_v40, %v3614_v48  ;;  %2489 = vmatpush.bf16.msra.mxu0 %v3667_v44  ;;  %v3806_v44 = vld [vmem:[#allocation16 + $0x180] sm:$0xf]  ;;  %v4213_v48 = vld [vmem:[#allocation16 + $0x188] sm:$0xf0] }
 0x29d   :  { %v1861_v60 = vrot.slane %v1860_v52, 1 }
 0x29e   :  { %v1879_v5 = vadd.f32 %v1878_v56, %v1875_v49  ;;  %2463 = vmatpush.bf16.msrb.mxu2 %v3759_v11  ;;  %v3746_v49 = vld [vmem:[#allocation16 + $0x108] sm:$0xf]  ;;  %v4173_v56 = vld [vmem:[#allocation16 + $0x4c] sm:$0xf]  ;;  %2454 = vmatpush.bf16.msrb.mxu1 %v3615_v61  ;;  %v4203_v11 = vld [vmem:[#allocation16 + $0x13c] sm:$0xf] }
 0x29f   :  { %v1862_v7 = vadd.f32 %v1861_v60, %v1860_v52  ;;  %v1821_v53 = vpop.f32.mrf.mxu2  ;;  %v1834_v9 = vpop.f32.mrf.mxu3  ;;  %v3747_v6 = vor.u32 %v4198_v50, %v3746_v49  ;;  %v4209_v60 = vld [vmem:[#allocation16 + $0x16c] sm:$0xf]  ;;  %v3655_v63 = vor.u32 %v4173_v56, %v3652_v58  ;;  %2477 = vmatpush.bf16.msrb.mxu3 %v3843_v36  ;;  %v4164_v61 = vld [vmem:[#allocation16 + $0x4] sm:$0xf]  ;;  %v3616_v49 = vld [vmem:[#allocation16 + $0xc] sm:$0xf0] }
 0x2a0   :  { %v1880_v24 = vrot.slane %v1879_v5, 2  ;;  %v3799_v3 = vor.u32 %v4209_v60, %v3796_v0  ;;  %v4233_v56 = vld [vmem:[#allocation16 + $0x22c] sm:$0xf]  ;;  %v3706_v36 = vld [vmem:[#allocation16 + $0xb0] sm:$0xf] }
 0x2a1   :  { %v1870_v13 = vmul.f32 %v1862_v7, %v4768_v20  ;;  %v1845_v17 = vpop.f32.mrf.mxu0  ;;  %v4195_v7 = vld [vmem:[#allocation16 + $0xf8] sm:$0xf0]  ;;  %2490 = vmatpush.bf16.msra.mxu0 %v3655_v63 }
 0x2a2   :  { %v4919_v15 = vadd.f32 %v1845_v17, %v1833_v14  ;;  %v1881_v41 = vadd.f32 %v1880_v24, %v1879_v5  ;;  %2464 = vmatpush.bf16.msrb.mxu2 %v3747_v6  ;;  %v3734_v5 = vld [vmem:[#allocation16 + $0xf0] sm:$0xf]  ;;  %2499 = vmatpush.bf16.msra.mxu1 %v3799_v3  ;;  %v3818_v24 = vld [vmem:[#allocation16 + $0x198] sm:$0xf]  ;;  %v4187_v60 = vld [vmem:[#allocation16 + $0xb8] sm:$0xf0] }
 0x2a3   :  { %v4922_v25 = vsub.f32 %v4909_v26, %v1870_v13  ;;  %v3735_v9 = vor.u32 %v4195_v7, %v3734_v5  ;;  %v3784_v13 = vld [vmem:[#allocation16 + $0x15c] sm:$0xf0]  ;;  %2478 = vmatpush.bf16.msrb.mxu3 %v3831_v10  ;;  %v3819_v31 = vor.u32 %v4216_v4, %v3818_v24  ;;  %v3760_v6 = vld [vmem:[#allocation16 + $0x12c] sm:$0xf0]  ;;  %v3707_v63 = vor.u32 %v4187_v60, %v3706_v36  ;;  %v4211_v0 = vld [vmem:[#allocation16 + $0x178] sm:$0xf0] }
 0x2a4   :  { %v1863_v29 = vrot.slane %v4919_v15, 4  ;;  %v1882_v42 = vrot.slane %v1881_v41, 1  ;;  %v3787_v21 = vor.u32 %v4206_v45, %v3784_v13  ;;  %v3748_v5 = vld [vmem:[#allocation16 + $0x114] sm:$0xf0]  ;;  %v4230_v7 = vld [vmem:[#allocation16 + $0x214] sm:$0xf] }
 0x2a5   :  { %v1876_v32 = vmul.f32 %v4922_v25, %v4922_v25  ;;  %2491 = vmatpush.bf16.msra.mxu0 %v3643_v19  ;;  %v3790_v10 = vld [vmem:[#allocation16 + $0x158] sm:$0xf]  ;;  %v4208_v13 = vld [vmem:[#allocation16 + $0x160] sm:$0xf0]  ;;  %v4181_v4 = vld [vmem:[#allocation16 + $0x88] sm:$0xf0] }
 0x2a6   :  { %v1864_v26 = vadd.f32 %v1863_v29, %v4919_v15  ;;  %v1883_v17 = vadd.f32 %v1882_v42, %v1881_v41  ;;  %2465 = vmatpush.bf16.msrb.mxu2 %v3735_v9  ;;  %v4167_v29 = vld [vmem:[#allocation16 + $0x1c] sm:$0xf]  ;;  %2500 = vmatpush.bf16.msra.mxu1 %v3787_v21  ;;  %v4189_v41 = vld [vmem:[#allocation16 + $0xc8] sm:$0xf0]  ;;  %v3802_v42 = vld [vmem:[#allocation16 + $0x170] sm:$0xf] }
 0x2a7   :  { %v1884_v43 = vrot.slane %v1876_v32, 4  ;;  %2479 = vmatpush.bf16.msrb.mxu3 %v3819_v31  ;;  %v3803_v3 = vor.u32 %v4211_v0, %v3802_v42  ;;  %v3778_v31 = vld [vmem:[#allocation16 + $0x140] sm:$0xf]  ;;  %v4221_v36 = vld [vmem:[#allocation16 + $0x1cc] sm:$0xf] }
 0x2a8   :  { %v1865_v46 = vrot.slane %v1864_v26, 2  ;;  %v1896_v34 = vmul.f32 %v1883_v17, %v4768_v20  ;;  %v4194_v17 = vld [vmem:[#allocation16 + $0xf4] sm:$0xf]  ;;  %v3658_v60 = vld [vmem:[#allocation16 + $0x50] sm:$0xf] }
 0x2a9   :  { %v1885_v37 = vadd.f32 %v1884_v43, %v1876_v32  ;;  %v1847_v52 = vpop.f32.mrf.mxu0  ;;  %v3631_v32 = vor.u32 %v4167_v29, %v3628_v1  ;;  %v4199_v0 = vld [vmem:[#allocation16 + $0x118] sm:$0xf0] }
 0x2aa   :  { %v1866_v57 = vadd.f32 %v1865_v46, %v1864_v26  ;;  %2466 = vmatpush.bf16.msrb.mxu2 %v3723_v28  ;;  %v3775_v26 = vor.u32 %v4203_v11, %v3772_v33  ;;  %v3807_v46 = vor.u32 %v4213_v48, %v3806_v44  ;;  %v4938_v50 = vadd.f32 1e-05, %v1896_v34  ;;  %v4200_v52 = vld [vmem:[#allocation16 + $0x124] sm:$0xf]  ;;  %v3682_v28 = vld [vmem:[#allocation16 + $0x80] sm:$0xf] }
 0x2ab   :  { %v1886_v62 = vrot.slane %v1885_v37, 2  ;;  %2492 = vmatpush.bf16.msra.mxu0 %v3631_v32  ;;  %v3763_v55 = vor.u32 %v4200_v52, %v3760_v6  ;;  %v3683_v1 = vor.u32 %v4181_v4, %v3682_v28  ;;  %v4205_v32 = vld [vmem:[#allocation16 + $0x148] sm:$0xf0]  ;;  %v4191_v11 = vld [vmem:[#allocation16 + $0xdc] sm:$0xf] }
 0x2ac   :  { %v1867_v59 = vrot.slane %v1866_v57, 1  ;;  %2501 = vmatpush.bf16.msra.mxu1 %v3775_v26  ;;  %2480 = vmatpush.bf16.msrb.mxu3 %v3807_v46  ;;  %v3724_v26 = vld [vmem:[#allocation16 + $0xe4] sm:$0xf0]  ;;  %v4178_v48 = vld [vmem:[#allocation16 + $0x70] sm:$0xf0]  ;;  %vm1908_vm13 = vweird.f32 %v4938_v50 }
 0x2ad   :  { %v1887_v53 = vadd.f32 %v1886_v62, %v1885_v37  ;;  %v3619_v37 = vor.u32 %v4164_v61, %v3616_v49  ;;  %v3670_v44 = vld [vmem:[#allocation16 + $0x68] sm:$0xf]  ;;  %v4202_v61 = vld [vmem:[#allocation16 + $0x130] sm:$0xf0] }
 0x2ae   :  { %v1868_v14 = vadd.f32 %v1867_v59, %v1866_v57  ;;  %v3892_v57 = vld [vmem:[#allocation16 + $0x234] sm:$0xf0]  ;;  %v4197_v59 = vld [vmem:[#allocation16 + $0x10c] sm:$0xf]  ;;  %v3766_v46 = vld [vmem:[#allocation16 + $0x128] sm:$0xf]  ;;  %v3671_v52 = vor.u32 %v4178_v48, %v3670_v44 }
 0x2af   :  { %v1888_v18 = vrot.slane %v1887_v53, 1  ;;  %2493 = vmatpush.bf16.msra.mxu0 %v3619_v37  ;;  %v3895_v58 = vor.u32 %v4233_v56, %v3892_v57  ;;  %v3751_v8 = vor.u32 %v4197_v59, %v3748_v5  ;;  %v3712_v56 = vld [vmem:[#allocation16 + $0xcc] sm:$0xf0]  ;;  %v4190_v48 = vld [vmem:[#allocation16 + $0xd0] sm:$0xf0] }
 0x2b0   :  { %v1871_v22 = vmul.f32 %v1868_v14, %v4768_v20  ;;  %2502 = vmatpush.bf16.msra.mxu1 %v3763_v55  ;;  %2525 = vmatpush.bf16.msra.mxu3 %v3707_v63  ;;  %v4184_v14 = vld [vmem:[#allocation16 + $0xa0] sm:$0xf0]  ;;  %v3754_v63 = vld [vmem:[#allocation16 + $0x110] sm:$0xf] }
 0x2b1   :  { %v1889_v27 = vadd.f32 %v1888_v18, %v1887_v53  ;;  %v3880_v53 = vld [vmem:[#allocation16 + $0x21c] sm:$0xf0]  ;;  %v3695_v45 = vor.u32 %v4184_v14, %v3694_v51  ;;  %v4188_v55 = vld [vmem:[#allocation16 + $0xc4] sm:$0xf]  ;;  %v3742_v51 = vld [vmem:[#allocation16 + $0xf8] sm:$0xf] }
 0x2b2   :  { %v4930_v30 = vsub.f32 %v4919_v15, %v1871_v22  ;;  %v3711_v15 = vor.u32 %v4189_v41, %v3710_v39  ;;  %v3883_v47 = vor.u32 %v4230_v7, %v3880_v53  ;;  %v3736_v18 = vld [vmem:[#allocation16 + $0xfc] sm:$0xf0]  ;;  %v3791_v22 = vor.u32 %v4208_v13, %v3790_v10  ;;  %v3856_v39 = vld [vmem:[#allocation16 + $0x1ec] sm:$0xf0]  ;;  %v4218_v53 = vld [vmem:[#allocation16 + $0x1b4] sm:$0xf] }
 0x2b3   :  { %v1897_v35 = vmul.f32 %v1889_v27, %v4768_v20  ;;  %2538 = vmatpush.bf16.msrb.mxu0 %v3803_v3  ;;  %v3739_v24 = vor.u32 %v4194_v17, %v3736_v18  ;;  %v3871_v27 = vor.u32 %v4227_v23, %v3868_v2  ;;  %v3715_v57 = vor.u32 %v4188_v55, %v3712_v56  ;;  %v4196_v10 = vld [vmem:[#allocation16 + $0x100] sm:$0xf0]  ;;  %v3634_v23 = vld [vmem:[#allocation16 + $0x20] sm:$0xf] }
 0x2b4   :  { %v1877_v38 = vmul.f32 %v4930_v30, %v4930_v30  ;;  %2467 = vmatpush.bf16.msrb.mxu2 %v3711_v15  ;;  %2503 = vmatpush.bf16.msra.mxu1 %v3751_v8  ;;  %v3727_v15 = vor.u32 %v4191_v11, %v3724_v26  ;;  %v3755_v7 = vor.u32 %v4199_v0, %v3754_v63  ;;  %v3646_v8 = vld [vmem:[#allocation16 + $0x38] sm:$0xf]  ;;  %v3808_v26 = vld [vmem:[#allocation16 + $0x18c] sm:$0xf0] }
 0x2b5   :  { %v4936_v43 = vadd.f32 1e-05, %v1897_v35  ;;  %2526 = vmatpush.bf16.msra.mxu3 %v3695_v45  ;;  %v3779_v35 = vor.u32 %v4205_v32, %v3778_v31 }
 0x2b6   :  { %v1890_v40 = vrot.slane %v1877_v38, 4 }
 0x2b7   :  { %4292 = vrsqrt.f32 %v4936_v43  ;;  %2539 = vmatpush.bf16.msrb.mxu0 %v3791_v22  ;;  %v3820_v22 = vld [vmem:[#allocation16 + $0x1a4] sm:$0xf0]  ;;  %vm1918_vm6 = vweird.f32 %v4936_v43 }
 0x2b8   :  { %v1891_v54 = vadd.f32 %v1890_v40, %v1877_v38  ;;  %4294 = vrsqrt.f32 %v4938_v50  ;;  %2512 = vmatpush.bf16.msra.mxu2 %v3895_v58  ;;  %v4224_v38 = vld [vmem:[#allocation16 + $0x1e4] sm:$0xf]  ;;  %2504 = vmatpush.bf16.msra.mxu1 %v3739_v24  ;;  %v3844_v58 = vld [vmem:[#allocation16 + $0x1d4] sm:$0xf0]  ;;  %v4169_v24 = vld [vmem:[#allocation16 + $0x28] sm:$0xf0] }
 0x2b9   :  { %v3859_v40 = vor.u32 %v4224_v38, %v3856_v39  ;;  %2527 = vmatpush.bf16.msra.mxu3 %v3683_v1  ;;  %v3847_v42 = vor.u32 %v4221_v36, %v3844_v58  ;;  %v3635_v31 = vor.u32 %v4169_v24, %v3634_v23  ;;  %v3622_v39 = vld [vmem:[#allocation16 + $0x8] sm:$0xf]  ;;  %v4223_v24 = vld [vmem:[#allocation16 + $0x1d8] sm:$0xf0] }
 0x2ba   :  { %v1892_v62 = vrot.slane %v1891_v54, 2 }
 0x2bb   :  { %2540 = vmatpush.bf16.msrb.mxu0 %v3779_v35  ;;  %v4212_v35 = vld [vmem:[#allocation16 + $0x184] sm:$0xf] }
 0x2bc   :  { %v1893_v9 = vadd.f32 %v1892_v62, %v1891_v54  ;;  %2513 = vmatpush.bf16.msra.mxu2 %v3883_v47  ;;  %v3767_v54 = vor.u32 %v4202_v61, %v3766_v46  ;;  %2505 = vmatpush.bf16.msra.mxu1 %v3727_v15  ;;  %v4175_v62 = vld [vmem:[#allocation16 + $0x58] sm:$0xf0]  ;;  %v4172_v47 = vld [vmem:[#allocation16 + $0x40] sm:$0xf0]  ;;  %v3718_v15 = vld [vmem:[#allocation16 + $0xc8] sm:$0xf] }
 0x2bd   :  { %v4942_v12 = vpop.eup %4292  ;;  %2528 = vmatpush.bf16.msra.mxu3 %v3671_v52  ;;  %v3659_v3 = vor.u32 %v4175_v62, %v3658_v60  ;;  %v3647_v17 = vor.u32 %v4172_v47, %v3646_v8 }
 0x2be   :  { %v1913_v19 = vmul.f32 %v4942_v12, %v4936_v43  ;;  %v1894_v21 = vrot.slane %v1893_v9, 1  ;;  %v4946_v33 = vpop.eup %4294  ;;  %vm1919_vm5 = vweird.f32 %v4942_v12  ;;  %v3811_v43 = vor.u32 %v4212_v35, %v3808_v26 }
 0x2bf   :  { %v1903_v49 = vmul.f32 %v4946_v33, %v4938_v50  ;;  %2541 = vmatpush.bf16.msrb.mxu0 %v3767_v54  ;;  %vm4960_vm7 = vmor %vm1918_vm6, %vm1919_vm5  ;;  %vm1909_vm10 = vweird.f32 %v4946_v33 }
 0x2c0   :  { %v1895_v29 = vadd.f32 %v1894_v21, %v1893_v9  ;;  %v1914_v34 = vmul.f32 %v4942_v12, %v1913_v19  ;;  %2514 = vmatpush.bf16.msra.mxu2 %v3871_v27  ;;  %v3832_v9 = vld [vmem:[#allocation16 + $0x1bc] sm:$0xf0]  ;;  %2506 = vmatpush.bf16.msra.mxu1 %v3715_v57  ;;  %v3743_v19 = vor.u32 %v4196_v10, %v3742_v51  ;;  %v4215_v21 = vld [vmem:[#allocation16 + $0x19c] sm:$0xf]  ;;  %vm1910_vm15 = vmor %vm1908_vm13, %vm1909_vm10 }
 0x2c1   :  { %v1904_v59 = vmul.f32 %v4946_v33, %v1903_v49  ;;  %v3835_v14 = vor.u32 %v4218_v53, %v3832_v9  ;;  %2529 = vmatpush.bf16.msra.mxu3 %v3659_v3  ;;  %v3730_v27 = vld [vmem:[#allocation16 + $0xe0] sm:$0xf]  ;;  %v3823_v4 = vor.u32 %v4215_v21, %v3820_v22  ;;  %v3898_v53 = vld [vmem:[#allocation16 + $0x230] sm:$0xf]  ;;  %v4235_v9 = vld [vmem:[#allocation16 + $0x238] sm:$0xf0] }
 0x2c2   :  { %v1898_v41 = vmul.f32 %v1895_v29, %v4768_v20  ;;  %v1915_v6 = vmul.f32 0.5, %v1914_v34  ;;  %v4193_v29 = vld [vmem:[#allocation16 + $0xe8] sm:$0xf0]  ;;  %v3862_v21 = vld [vmem:[#allocation16 + $0x1e8] sm:$0xf] }
 0x2c3   :  { %v1905_v13 = vmul.f32 0.5, %v1904_v59  ;;  %2542 = vmatpush.bf16.msrb.mxu0 %v3755_v7  ;;  %v3731_v34 = vor.u32 %v4193_v29, %v3730_v27  ;;  %v4226_v22 = vld [vmem:[#allocation16 + $0x1f0] sm:$0xf0] }
 0x2c4   :  { %v4952_v37 = vadd.f32 1e-05, %v1898_v41  ;;  %2515 = vmatpush.bf16.msra.mxu2 %v3859_v40  ;;  %v1916_v5 = vsub.f32 1.5, %v1915_v6  ;;  %v4166_v41 = vld [vmem:[#allocation16 + $0x10] sm:$0xf0]  ;;  %v3863_v23 = vor.u32 %v4226_v22, %v3862_v21 }
 0x2c5   :  { %v1906_v1 = vsub.f32 1.5, %v1905_v13  ;;  %2530 = vmatpush.bf16.msra.mxu3 %v3647_v17  ;;  %v3623_v46 = vor.u32 %v4166_v41, %v3622_v39  ;;  %v1849_v6 = vld [vmem:[%s5025_s8] sm:$0x7]  ;;  %v3899_v13 = vor.u32 %v4235_v9, %v3898_v53  ;;  %v3886_v17 = vld [vmem:[#allocation16 + $0x218] sm:$0xf] }
 0x2c6   :  { %4296 = vrsqrt.f32 %v4952_v37  ;;  %v1917_v2 = vmul.f32 %v4942_v12, %v1916_v5  ;;  %vm1928_vm12 = vweird.f32 %v4952_v37 }
 0x2c7   :  { %2543 = vmatpush.bf16.msrb.mxu0 %v3743_v19  ;;  %v1907_v40 = vmul.f32 %v4946_v33, %v1906_v1  ;;  %v3826_v1 = vld [vmem:[#allocation16 + $0x1a0] sm:$0xf] }
 0x2c8   :  { %2516 = vmatpush.bf16.msra.mxu2 %v3847_v42  ;;  %v1921_v38 = vsel %vm4960_vm7, %v4942_v12, %v1917_v2  ;;  %v3719_v12 = vor.u32 %v4190_v48, %v3718_v15  ;;  %v3850_v2 = vld [vmem:[#allocation16 + $0x1d0] sm:$0xf] }
 0x2c9   :  { %2531 = vmatpush.bf16.msra.mxu3 %v3635_v31  ;;  %v1935_v49 = vrot.slane %v1921_v38, 7  ;;  %v1911_v54 = vsel %vm1910_vm15, %v4946_v33, %v1907_v40  ;;  %v3851_v27 = vor.u32 %v4223_v24, %v3850_v2  ;;  %v4217_v31 = vld [vmem:[#allocation16 + $0x1a8] sm:$0xf0] }
 0x2ca   :  { %v3827_v32 = vor.u32 %v4217_v31, %v3826_v1  ;;  %v4258_v1 = vld [vmem:[#allocation19 + $0xb0] sm:$0xff] }
 0x2cb   :  { %2544 = vmatpush.bf16.msrb.mxu0 %v3731_v34  ;;  %v1937_v56 = vsel %vm505_vm9, %v1911_v54, %v1935_v49  ;;  %v4214_v34 = vld [vmem:[#allocation16 + $0x190] sm:$0xf0] }
 0x2cc   :  { %v4297_v45 = vpop.eup %4296  ;;  %2517 = vmatpush.bf16.msra.mxu2 %v3835_v14 }
 0x2cd   :  { %v1923_v18 = vmul.f32 %v4297_v45, %v4952_v37  ;;  %vm1929_vm8 = vweird.f32 %v4297_v45  ;;  %2532 = vmatpush.bf16.msra.mxu3 %v3623_v46  ;;  %v1850_v37 = vld [vmem:[#allocation14] sm:$0x7] }
 0x2ce   :  { %vm1930_vm14 = vmor %vm1928_vm12, %vm1929_vm8  ;;  %v1952_v50 = vperm.slane %v1850_v37, 0  ;;  %v1953_v58 = vperm.slane %v1850_v37, 1  ;;  %v1954_v63 = vperm.slane %v1850_v37, 2 }
 0x2cf   :  { %v1924_v28 = vmul.f32 %v4297_v45, %v1923_v18  ;;  %2545 = vmatpush.bf16.msrb.mxu0 %v3719_v12  ;;  %v4232_v18 = vld [vmem:[#allocation16 + $0x220] sm:$0xf0] }
 0x2d0   :  { %2518 = vmatpush.bf16.msra.mxu2 %v3823_v4  ;;  %v4220_v4 = vld [vmem:[#allocation16 + $0x1c0] sm:$0xf0] }
 0x2d1   :  { %v1925_v11 = vmul.f32 0.5, %v1924_v28  ;;  %v3838_v28 = vld [vmem:[#allocation16 + $0x1b8] sm:$0xf] }
 0x2d2   :  { %v3839_v29 = vor.u32 %v4220_v4, %v3838_v28  ;;  %v4242_v28 = vld [vmem:[#allocation19 + $0x30] sm:$0xff] }
 0x2d3   :  { %v1926_v44 = vsub.f32 1.5, %v1925_v11  ;;  %v3814_v11 = vld [vmem:[#allocation16 + $0x188] sm:$0xf]  ;;  %v4250_v4 = vld [vmem:[#allocation19 + $0x70] sm:$0xff] }
 0x2d4   :  { %2519 = vmatpush.bf16.msra.mxu2 %v3811_v43  ;;  %v3815_v35 = vor.u32 %v4214_v34, %v3814_v11 }
 0x2d5   :  { %v1927_v61 = vmul.f32 %v4297_v45, %v1926_v44 }
 0x2d7   :  { %v1931_v52 = vsel %vm1930_vm14, %v4297_v45, %v1927_v61 }
 0x2d8   :  { %v1936_v55 = vrot.slane %v1931_v52, 6 }
 0x2da   :  { %v1938_v57 = vsel %vm507_vm11, %v1937_v56, %v1936_v55 }
 0x2db   :  { %v1940_v36 = vmul.f32 %v1938_v57, %v1849_v6 }
 0x2dd   :  { %v1944_v60 = vperm.slane %v1940_v36, 2  ;;  %v1942_v42 = vperm.slane %v1940_v36, 0  ;;  %v1943_v62 = vperm.slane %v1940_v36, 1 }
 0x2df   :  { %v1950_v0 = vmul.f32 %v1944_v60, %v4930_v30  ;;  %v1948_v59 = vmul.f32 %v1942_v42, %v4914_v16  ;;  %v1949_v33 = vmul.f32 %v1943_v62, %v4922_v25  ;;  %v3887_v16 = vor.u32 %v4232_v18, %v3886_v17  ;;  %v3874_v25 = vld [vmem:[#allocation16 + $0x200] sm:$0xf]  ;;  %v4229_v30 = vld [vmem:[#allocation16 + $0x208] sm:$0xf0] }
 0x2e0   :  { %v3875_v19 = vor.u32 %v4229_v30, %v3874_v25  ;;  %v4243_v25 = vld [vmem:[#allocation19 + $0x38] sm:$0xff] }
 0x2e1   :  { %v1958_v3 = vadd.f32 %v1952_v50, %v1948_v59  ;;  %v1959_v5 = vadd.f32 %v1953_v58, %v1949_v33  ;;  %v1960_v7 = vadd.f32 %v1954_v63, %v1950_v0  ;;  %v4251_v30 = vld [vmem:[#allocation19 + $0x78] sm:$0xff] }
 0x2e3   :  { %v1961_v8 = vmax.f32 %v1958_v3, 0.0  ;;  %v1962_v47 = vmax.f32 %v1959_v5, 0.0  ;;  %v1963_v51 = vmax.f32 %v1960_v7, 0.0 }
 0x2e5   :  { %v1964_v14 = vpack.c.bf16 %v1961_v8, %v1961_v8  ;;  %v1965_v10 = vpack.c.bf16 %v1962_v47, %v1962_v47  ;;  %v1966_v45 = vpack.c.bf16 %v1963_v51, %v1963_v51 }
 0x2e7   :  { %2455 = vmatmul.bf16.vlgmr.msrb.gmra.mxu1 %v1964_v14  ;;  %2468 = vmatmul.bf16.vlgmr.msrb.gmra.mxu2 %v1965_v10 }
 0x2e8   :  { %2481 = vmatmul.bf16.vlgmr.msrb.gmra.mxu3 %v1966_v45  ;;  %2494 = vmatmul.bf16.vlgmr.msra.gmra.mxu0 %v1964_v14 }
 0x2e9   :  { %2551 = vmatpush.bf16.msrb.mxu1 %v3899_v13  ;;  %2878 = vmatpush.bf16.msrb.mxu2 %v4243_v25 }
 0x2ea   :  { %2891 = vmatpush.bf16.msrb.mxu3 %v4251_v30 }
 0x2ed   :  { %2552 = vmatpush.bf16.msrb.mxu1 %v3887_v16  ;;  %2879 = vmatpush.bf16.msrb.mxu2 %v4242_v28 }
 0x2ee   :  { %2892 = vmatpush.bf16.msrb.mxu3 %v4250_v4 }
 0x2f1   :  { %2553 = vmatpush.bf16.msrb.mxu1 %v3875_v19  ;;  %v4259_v19 = vld [vmem:[#allocation19 + $0xb8] sm:$0xff] }
 0x2f2   :  { %2904 = vmatpush.bf16.msra.mxu0 %v4259_v19 }
 0x2f5   :  { %2554 = vmatpush.bf16.msrb.mxu1 %v3863_v23 }
 0x2f6   :  { %2905 = vmatpush.bf16.msra.mxu0 %v4258_v1 }
 0x2f7   :  { %2507 = vmatmul.bf16.vlgmr.msra.gmra.mxu1 %v1965_v10  ;;  %2520 = vmatmul.bf16.vlgmr.msra.gmra.mxu2 %v1966_v45 }
 0x2f8   :  { %2533 = vmatmul.bf16.vlgmr.msra.gmra.mxu3 %v1964_v14  ;;  %2546 = vmatmul.bf16.vlgmr.msrb.gmra.mxu0 %v1965_v10 }
 0x2f9   :  { %2555 = vmatpush.bf16.msrb.mxu1 %v3851_v27 }
 0x2fd   :  { %2556 = vmatpush.bf16.msrb.mxu1 %v3839_v29 }
 0x301   :  { %2557 = vmatpush.bf16.msrb.mxu1 %v3827_v32 }
 0x305   :  { %2558 = vmatpush.bf16.msrb.mxu1 %v3815_v35  ;;  %v4241_v35 = vld [vmem:[#allocation19 + $0x28] sm:$0xff] }
 0x306   :  { %2880 = vmatpush.bf16.msrb.mxu2 %v4241_v35  ;;  %v2565_v35 = vld [vmem:[#allocation17] sm:$0x7] }
 0x308   :  { %2559 = vmatmul.bf16.vlgmr.msrb.gmra.mxu1 %v1966_v45 }
 0x364   :  { %v2456_v26 = vpop.f32.mrf.mxu1 }
 0x365   :  { %v2495_v38 = vpop.f32.mrf.mxu0 }
 0x36a   :  { %v2469_v39 = vpop.f32.mrf.mxu2 }
 0x36b   :  { %v2470_v41 = vadd.f32 %v2469_v39, %v2456_v26  ;;  %v2482_v15 = vpop.f32.mrf.mxu3  ;;  %v4249_v26 = vld [vmem:[#allocation19 + $0x68] sm:$0xff] }
 0x36c   :  { %v2458_v44 = vpop.f32.mrf.mxu1  ;;  %2893 = vmatpush.bf16.msrb.mxu3 %v4249_v26 }
 0x36d   :  { %v2483_v43 = vadd.f32 %v2482_v15, %v2470_v41  ;;  %v2497_v48 = vpop.f32.mrf.mxu0 }
 0x36e   :  { %v4240_v48 = vld [vmem:[#allocation19 + $0x20] sm:$0xff] }
 0x36f   :  { %v2566_v40 = vrot.slane %v2483_v43, 4  ;;  %2881 = vmatpush.bf16.msrb.mxu2 %v4240_v48 }
 0x371   :  { %v2567_v46 = vadd.f32 %v2566_v40, %v2483_v43  ;;  %v4248_v40 = vld [vmem:[#allocation19 + $0x60] sm:$0xff] }
 0x372   :  { %v2471_v61 = vpop.f32.mrf.mxu2  ;;  %2894 = vmatpush.bf16.msrb.mxu3 %v4248_v40  ;;  %v2669_v40 = vperm.slane %v2565_v35, 2 }
 0x373   :  { %v2568_v49 = vrot.slane %v2567_v46, 2  ;;  %v2484_v12 = vpop.f32.mrf.mxu3 }
 0x374   :  { %v2508_v52 = vpop.f32.mrf.mxu1 }
 0x375   :  { %v2569_v6 = vadd.f32 %v2568_v49, %v2567_v46  ;;  %v2547_v54 = vpop.f32.mrf.mxu0  ;;  %v2509_v37 = vadd.f32 %v2508_v52, %v2495_v38  ;;  %v4257_v38 = vld [vmem:[#allocation19 + $0xa8] sm:$0xff]  ;;  %v4256_v46 = vld [vmem:[#allocation19 + $0xa0] sm:$0xff] }
 0x376   :  { %2906 = vmatpush.bf16.msra.mxu0 %v4257_v38 }
 0x377   :  { %v2570_v55 = vrot.slane %v2569_v6, 1 }
 0x379   :  { %v2571_v56 = vadd.f32 %v2570_v55, %v2569_v6  ;;  %v4247_v55 = vld [vmem:[#allocation19 + $0x58] sm:$0xff] }
 0x37a   :  { %v2521_v57 = vpop.f32.mrf.mxu2  ;;  %2907 = vmatpush.bf16.msra.mxu0 %v4256_v46  ;;  %2895 = vmatpush.bf16.msrb.mxu3 %v4247_v55 }
 0x37b   :  { %v2584_v36 = vmul.f32 %v2571_v56, %v4768_v20  ;;  %v2522_v50 = vadd.f32 %v2521_v57, %v2509_v37  ;;  %v2534_v58 = vpop.f32.mrf.mxu3  ;;  %v4255_v56 = vld [vmem:[#allocation19 + $0x98] sm:$0xff] }
 0x37c   :  { %v2510_v60 = vpop.f32.mrf.mxu1  ;;  %v2548_v8 = vadd.f32 %v2547_v54, %v2534_v58  ;;  %v4239_v54 = vld [vmem:[#allocation19 + $0x18] sm:$0xff]  ;;  %v4238_v58 = vld [vmem:[#allocation19 + $0x10] sm:$0xff] }
 0x37d   :  { %v4981_v42 = vsub.f32 %v2483_v43, %v2584_v36  ;;  %v2572_v62 = vrot.slane %v2522_v50, 4  ;;  %v2549_v63 = vpop.f32.mrf.mxu0  ;;  %2882 = vmatpush.bf16.msrb.mxu2 %v4239_v54  ;;  %v4246_v60 = vld [vmem:[#allocation19 + $0x50] sm:$0xff] }
 0x37e   :  { %2908 = vmatpush.bf16.msra.mxu0 %v4255_v56  ;;  %2896 = vmatpush.bf16.msrb.mxu3 %v4246_v60 }
 0x37f   :  { %v2590_v0 = vmul.f32 %v4981_v42, %v4981_v42  ;;  %v2573_v59 = vadd.f32 %v2572_v62, %v2522_v50  ;;  %v4254_v62 = vld [vmem:[#allocation19 + $0x90] sm:$0xff] }
 0x381   :  { %v2593_v33 = vrot.slane %v2590_v0, 4  ;;  %v2574_v3 = vrot.slane %v2573_v59, 2  ;;  %2883 = vmatpush.bf16.msrb.mxu2 %v4238_v58 }
 0x382   :  { %v2523_v5 = vpop.f32.mrf.mxu2  ;;  %2909 = vmatpush.bf16.msra.mxu0 %v4254_v62 }
 0x383   :  { %v2594_v7 = vadd.f32 %v2593_v33, %v2590_v0  ;;  %v2575_v53 = vadd.f32 %v2574_v3, %v2573_v59  ;;  %v2536_v9 = vpop.f32.mrf.mxu3  ;;  %v4237_v59 = vld [vmem:[#allocation19 + $0x8] sm:$0xff] }
 0x384   :  { %v4245_v33 = vld [vmem:[#allocation19 + $0x48] sm:$0xff]  ;;  %v4244_v9 = vld [vmem:[#allocation19 + $0x40] sm:$0xff] }
 0x385   :  { %v2576_v47 = vrot.slane %v2575_v53, 1  ;;  %v2560_v51 = vpop.f32.mrf.mxu1  ;;  %v2595_v14 = vrot.slane %v2594_v7, 2  ;;  %v4253_v3 = vld [vmem:[#allocation19 + $0x88] sm:$0xff]  ;;  %2884 = vmatpush.bf16.msrb.mxu2 %v4237_v59  ;;  %2897 = vmatpush.bf16.msrb.mxu3 %v4245_v33 }
 0x386   :  { %v2561_v10 = vadd.f32 %v2560_v51, %v2548_v8  ;;  %2910 = vmatpush.bf16.msra.mxu0 %v4253_v3 }
 0x387   :  { %v2577_v45 = vadd.f32 %v2576_v47, %v2575_v53  ;;  %v2596_v18 = vadd.f32 %v2595_v14, %v2594_v7  ;;  %v4236_v53 = vld [vmem:[#allocation19] sm:$0xff] }
 0x388   :  { %v2578_v13 = vrot.slane %v2561_v10, 4  ;;  %v4252_v47 = vld [vmem:[#allocation19 + $0x80] sm:$0xff] }
 0x389   :  { %v2585_v17 = vmul.f32 %v2577_v45, %v4768_v20  ;;  %v2597_v24 = vrot.slane %v2596_v18, 1  ;;  %2885 = vmatpush.bf16.msrb.mxu2 %v4236_v53  ;;  %2898 = vmatpush.bf16.msrb.mxu3 %v4244_v9 }
 0x38a   :  { %v2579_v16 = vadd.f32 %v2578_v13, %v2561_v10  ;;  %2911 = vmatpush.bf16.msra.mxu0 %v4252_v47 }
 0x38b   :  { %v4986_v21 = vsub.f32 %v2522_v50, %v2585_v17  ;;  %v2598_v11 = vadd.f32 %v2597_v24, %v2596_v18 }
 0x38c   :  { %v2580_v22 = vrot.slane %v2579_v16, 2 }
 0x38d   :  { %v2591_v23 = vmul.f32 %v4986_v21, %v4986_v21  ;;  %v2562_v2 = vpop.f32.mrf.mxu1  ;;  %v2611_v44 = vmul.f32 %v2598_v11, %v4768_v20 }
 0x38e   :  { %v2581_v27 = vadd.f32 %v2580_v22, %v2579_v16 }
 0x38f   :  { %v2599_v29 = vrot.slane %v2591_v23, 4  ;;  %v4996_v52 = vadd.f32 1e-05, %v2611_v44 }
 0x390   :  { %v2582_v31 = vrot.slane %v2581_v27, 1 }
 0x391   :  { %v2600_v32 = vadd.f32 %v2599_v29, %v2591_v23  ;;  %4298 = vrsqrt.f32 %v4996_v52  ;;  %vm2623_vm6 = vweird.f32 %v4996_v52 }
 0x392   :  { %v2583_v34 = vadd.f32 %v2582_v31, %v2581_v27  ;;  %v2564_v31 = vld [vmem:[%s5028_s11] sm:$0x7] }
 0x393   :  { %v2601_v39 = vrot.slane %v2600_v32, 2 }
 0x394   :  { %v2586_v41 = vmul.f32 %v2583_v34, %v4768_v20 }
 0x395   :  { %v2602_v15 = vadd.f32 %v2601_v39, %v2600_v32  ;;  %v2667_v39 = vperm.slane %v2565_v35, 0 }
 0x396   :  { %v4992_v43 = vsub.f32 %v2561_v10, %v2586_v41  ;;  %v2668_v41 = vperm.slane %v2565_v35, 1 }
 0x397   :  { %v2603_v61 = vrot.slane %v2602_v15, 1  ;;  %v4299_v5 = vpop.eup %4298 }
 0x398   :  { %v2592_v49 = vmul.f32 %v4992_v43, %v4992_v43  ;;  %v2618_v10 = vmul.f32 %v4299_v5, %v4996_v52  ;;  %vm2624_vm4 = vweird.f32 %v4299_v5 }
 0x399   :  { %v2604_v12 = vadd.f32 %v2603_v61, %v2602_v15  ;;  %vm2625_vm8 = vmor %vm2623_vm6, %vm2624_vm4 }
 0x39a   :  { %v2605_v6 = vrot.slane %v2592_v49, 4  ;;  %v2619_v18 = vmul.f32 %v4299_v5, %v2618_v10 }
 0x39b   :  { %v2612_v37 = vmul.f32 %v2604_v12, %v4768_v20 }
 0x39c   :  { %v2606_v57 = vadd.f32 %v2605_v6, %v2592_v49  ;;  %v2620_v30 = vmul.f32 0.5, %v2619_v18 }
 0x39d   :  { %v2615_v36 = vadd.f32 1e-05, %v2612_v37 }
 0x39e   :  { %v2607_v50 = vrot.slane %v2606_v57, 2  ;;  %v2621_v2 = vsub.f32 1.5, %v2620_v30 }
 0x39f   :  { %4300 = vrsqrt.f32 %v2615_v36  ;;  %vm2633_vm1 = vweird.f32 %v2615_v36 }
 0x3a0   :  { %v2608_v63 = vadd.f32 %v2607_v50, %v2606_v57  ;;  %v2622_v28 = vmul.f32 %v4299_v5, %v2621_v2 }
 0x3a2   :  { %v2609_v0 = vrot.slane %v2608_v63, 1  ;;  %v2626_v32 = vsel %vm2625_vm8, %v4299_v5, %v2622_v28 }
 0x3a4   :  { %v2610_v7 = vadd.f32 %v2609_v0, %v2608_v63 }
 0x3a5   :  { %v4301_v8 = vpop.eup %4300 }
 0x3a6   :  { %v2628_v51 = vmul.f32 %v4301_v8, %v2615_v36  ;;  %v2613_v14 = vmul.f32 %v2610_v7, %v4768_v20  ;;  %vm2634_vm0 = vweird.f32 %v4301_v8 }
 0x3a7   :  { %vm2635_vm2 = vmor %vm2633_vm1, %vm2634_vm0 }
 0x3a8   :  { %v2629_v45 = vmul.f32 %v4301_v8, %v2628_v51  ;;  %v2616_v13 = vadd.f32 1e-05, %v2613_v14 }
 0x3aa   :  { %v2630_v17 = vmul.f32 0.5, %v2629_v45  ;;  %4302 = vrsqrt.f32 %v2616_v13  ;;  %vm2643_vm5 = vweird.f32 %v2616_v13 }
 0x3ac   :  { %v2631_v16 = vsub.f32 1.5, %v2630_v17 }
 0x3ae   :  { %v2632_v22 = vmul.f32 %v4301_v8, %v2631_v16 }
 0x3b0   :  { %v4303_v25 = vpop.eup %4302  ;;  %v2636_v24 = vsel %vm2635_vm2, %v4301_v8, %v2632_v22 }
 0x3b1   :  { %v2638_v19 = vmul.f32 %v4303_v25, %v2616_v13  ;;  %vm2644_vm3 = vweird.f32 %v4303_v25  ;;  %v2650_v29 = vrot.slane %v2636_v24, 7 }
 0x3b2   :  { %vm2645_vm7 = vmor %vm2643_vm5, %vm2644_vm3 }
 0x3b3   :  { %v2639_v23 = vmul.f32 %v4303_v25, %v2638_v19  ;;  %v2652_v34 = vsel %vm505_vm9, %v2626_v32, %v2650_v29 }
 0x3b5   :  { %v2640_v20 = vmul.f32 0.5, %v2639_v23 }
 0x3b7   :  { %v2641_v27 = vsub.f32 1.5, %v2640_v20 }
 0x3b9   :  { %v2642_v4 = vmul.f32 %v4303_v25, %v2641_v27 }
 0x3bb   :  { %v2646_v1 = vsel %vm2645_vm7, %v4303_v25, %v2642_v4 }
 0x3bc   :  { %v2651_v11 = vrot.slane %v2646_v1, 6 }
 0x3be   :  { %v2653_v26 = vsel %vm507_vm11, %v2652_v34, %v2651_v11 }
 0x3bf   :  { %v2655_v38 = vmul.f32 %v2653_v26, %v2564_v31 }
 0x3c1   :  { %v2659_v15 = vperm.slane %v2655_v38, 2  ;;  %v2657_v44 = vperm.slane %v2655_v38, 0  ;;  %v2658_v48 = vperm.slane %v2655_v38, 1 }
 0x3c3   :  { %v2665_v46 = vmul.f32 %v2659_v15, %v4992_v43  ;;  %v2663_v61 = vmul.f32 %v2657_v44, %v4981_v42  ;;  %v2664_v49 = vmul.f32 %v2658_v48, %v4986_v21  ;;  %v4277_v43 = vld [vmem:[%s5031_s14] ss:$0 sm:$0xff] }
 0x3c5   :  { %v2673_v12 = vadd.f32 %v2667_v39, %v2663_v61  ;;  %v2674_v52 = vadd.f32 %v2668_v41, %v2664_v49  ;;  %v2675_v6 = vadd.f32 %v2669_v40, %v2665_v46 }
 0x3c7   :  { %v2676_v54 = vmax.f32 %v2673_v12, 0.0  ;;  %v2677_v55 = vmax.f32 %v2674_v52, 0.0  ;;  %v2678_v56 = vmax.f32 %v2675_v6, 0.0 }
 0x3c9   :  { %v2679_v37 = vpack.c.bf16 %v2676_v54, %v2676_v54  ;;  %v2680_v57 = vpack.c.bf16 %v2677_v55, %v2677_v55  ;;  %v2681_v36 = vpack.c.bf16 %v2678_v56, %v2678_v56 }
 0x3cb   :  { %2886 = vmatmul.bf16.vlgmr.msrb.gmra.mxu2 %v2679_v37  ;;  %2899 = vmatmul.bf16.vlgmr.msrb.gmra.mxu3 %v2680_v57 }
 0x3cc   :  { %2912 = vmatmul.bf16.vlgmr.msra.gmra.mxu0 %v2681_v36 }
 0x449   :  { %v2913_v50 = vpop.f32.mrf.mxu0 }
 0x44e   :  { %v2887_v42 = vpop.f32.mrf.mxu2  ;;  %v2900_v58 = vpop.f32.mrf.mxu3 }
 0x44f   :  { %v2888_v21 = vadd.f32 %v4277_v43, %v2887_v42 }
 0x451   :  { %v2901_v60 = vadd.f32 %v2900_v58, %v2888_v21  ;;  %v2915_v62 = vpop.f32.mrf.mxu0 }
 0x453   :  { %v2914_v63 = vadd.f32 %v2913_v50, %v2901_v60 }
 0x455   :  { %2917 = vst [vmem:[#allocation20] sm:$0xff] %v2914_v63 }
 0x456   :  { %v2889_v0 = vpop.f32.mrf.mxu2  ;;  %v2902_v59 = vpop.f32.mrf.mxu3  ;;  %2928 = dma.vmem_to_hbm [thread:$0]  %s2924_s0, 128, %s2926_s24, [#allocation4]  }
 0x457   :  { %4604 = dma.done.wait [#allocation4], 128  }
 0x458   :  { %4605 = vsyncadd [#allocation4], 4294967168 }
 0x459   :  { %2933 = vsyncpa [#allocation3], 1 }
 0x45a   :  { %2934 = vsyncpa [#allocation6], 1 }
 0x45b   :  { %2935 = vsyncpa [#allocation9], 1 }
 0x45c   :  { %2936 = vsyncpa [#allocation12], 1 }
 0x45d   :  { %2937 = vsyncpa [#allocation15], 1 }
 0x45e   :  { %2938 = vsyncpa [#allocation18], 1 }
 0x45f   :  { %2939 = vsyncpa [#allocation4], 1 }

</bundles_post_ra>
